<compile_context>
chip_gen: v7x
topology: tpu7x:2x2x1
jax: 0.10.0
libtpu: 0.0.40
codegen_flags: <defaults>
</compile_context>

<pallas_src>
import functools

import jax
import jax.numpy as jnp
from jax.experimental import pallas as pl
from jax.experimental.pallas import tpu as pltpu

_LANE = 128
_NEG_PAD = -1e30  # logit bias for padded output classes -> ~0 probability, no NaNs


def _round_up(n: int, m: int) -> int:
    return ((n + m - 1) // m) * m


def _num_tensorcores() -> int:
    """Best-effort TC count per chip: 2 on v7x, 1 on v5e/v6e (and in interpret/CPU)."""
    try:
        kind = (getattr(jax.devices()[0], "device_kind", "") or "").lower()
        if "v7" in kind:
            return 2
    except Exception:
        pass
    return 1


def _default_block_batch(batch: int) -> int:
    """Whole-batch tile on single-TC parts; keep the grid >= 2 on dual-TC v7x."""
    batch8 = _round_up(max(batch, 8), 8)
    tb = _round_up(pl.cdiv(batch8, _num_tensorcores()), 8)
    return max(8, min(tb, 512))


def _make_mlp_kernel(num_layers: int,
                     negative_slope: float = 0.01,
                     mode: str = "inference",
                     matmul_dtype=jnp.bfloat16):
    """Pallas kernel closure: fixed number of (Linear -> LeakyReLU) blocks + (log)softmax."""

    def kernel(*refs):
        x_ref = refs[0]
        out_ref = refs[-1]
        param_refs = refs[1:-1]  # w0, b0, w1, b1, ...

        h = x_ref[...]                                   # bf16 activation tile
        for k in range(num_layers):
            w = param_refs[2 * k][...]                   # [in_k, out_k], bf16
            b = param_refs[2 * k + 1][...]               # [1, out_k], f32
            # MXU matmul: bf16 operands, f32 accumulation; bias added in f32.
            h = jnp.dot(h.astype(matmul_dtype), w,
                        preferred_element_type=jnp.float32) + b
            # LeakyReLU (PyTorch default negative_slope=0.01); VPU math stays f32.
            h = jnp.where(h >= 0, h, negative_slope * h)
            # Dropout(p=0.5): identity in eval/inference mode.

        # Softmax / LogSoftmax along last dim (numerically stable, exact normalization).
        m = jnp.max(h, axis=-1, keepdims=True)
        e = jnp.exp(h - m)
        s = jnp.sum(e, axis=-1, keepdims=True)
        if mode == "inference":
            h = e / s                                    # exact: rows sum to 1 to f32 precision
        elif mode == "self_train":
            h = (h - m) - jnp.log(s)
        # any other mode: raw logits (matches the PyTorch forward's fall-through)

        out_ref[...] = h.astype(out_ref.dtype)

    return kernel


def prepare_params(weights, biases, matmul_dtype=jnp.bfloat16):
    """Lane-pad + cast the MLP params ONCE (hoisted out of the per-call hot path).

    weights: list of [h_sizes[k], h_sizes[k+1]]   (transposed from PyTorch's [out, in])
    biases:  list of [1, h_sizes[k+1]] (or [h_sizes[k+1]])
    Returns flat list [w0, b0, w1, b1, ...] of padded arrays (bf16 weights, f32 biases).
    """
    assert len(weights) == len(biases)
    num_layers = len(weights)
    params = []
    for k, (w, b) in enumerate(zip(weights, biases)):
        in_p = _round_up(w.shape[0], _LANE)
        out_p = _round_up(w.shape[1], _LANE)
        w_pad = jnp.pad(w, ((0, in_p - w.shape[0]), (0, out_p - w.shape[1])))
        b2 = jnp.reshape(b, (1, -1))
        if k == num_layers - 1:
            # Padded classes get a huge negative logit -> zero probability after softmax.
            # This relies on biases staying f32 and being added post-accumulation.
            b_pad = jnp.pad(b2, ((0, 0), (0, out_p - b2.shape[1])),
                            constant_values=_NEG_PAD)
        else:
            b_pad = jnp.pad(b2, ((0, 0), (0, out_p - b2.shape[1])))
        params.append(w_pad.astype(matmul_dtype))      # bf16 weights: half the HBM traffic
        params.append(b_pad.astype(jnp.float32))       # keep f32 (see note above)
    return params


def feed_forward_flexible(x, padded_params, *, out_dim, mode="inference",
                          block_batch=None, matmul_dtype=jnp.bfloat16):
    """MLP + softmax as a batch-tiled Pallas call.

    x:             [batch, h_sizes[0]]  (pre-encoded features; raw_text=False path)
    padded_params: output of prepare_params()
    out_dim:       number of real output classes (static)
    """
    num_layers = len(padded_params) // 2
    batch, in_dim = x.shape
    pdims = [padded_params[0].shape[0]] + [padded_params[2 * k].shape[1]
                                           for k in range(num_layers)]
    assert in_dim <= pdims[0] and out_dim <= pdims[-1]

    # ---- activation stream: lane-pad then ship in bf16 (dominant HBM stream halved) ----
    x_p = jnp.pad(x, ((0, 0), (0, pdims[0] - in_dim))).astype(matmul_dtype)

    # ---- batch tiling (generation-aware default) ----
    if block_batch is None:
        block_batch = _default_block_batch(batch)
    tb = max(8, min(_round_up(block_batch, 8), 512))
    batch_p = _round_up(batch, tb)
    if batch_p != batch:
        x_p = jnp.pad(x_p, ((0, batch_p - batch), (0, 0)))
    grid = (batch_p // tb,)

    kernel = _make_mlp_kernel(num_layers, mode=mode, matmul_dtype=matmul_dtype)

    in_specs = [pl.BlockSpec((tb, pdims[0]), lambda i: (i, 0))]
    for k in range(num_layers):
        # Weights / biases: constant block index -> stay VMEM-resident across grid steps.
        in_specs.append(pl.BlockSpec((pdims[k], pdims[k + 1]), lambda i: (0, 0)))
        in_specs.append(pl.BlockSpec((1, pdims[k + 1]), lambda i: (0, 0)))
    out_specs = pl.BlockSpec((tb, pdims[-1]), lambda i: (i, 0))

    flops = 2 * batch_p * sum(pdims[k] * pdims[k + 1] for k in range(num_layers))
    weight_bytes = sum(int(p.size) * p.dtype.itemsize for p in padded_params)
    bytes_accessed = (batch_p * pdims[0] * 2          # bf16 activations in
                      + weight_bytes
                      + batch_p * pdims[-1] * 4)      # f32 probabilities out
    transcendentals = batch_p * pdims[-1] + batch_p   # exp + log/div

    out_padded = pl.pallas_call(
        kernel,
        # Output dtype pinned to f32 (does NOT follow x.dtype / the bf16 input stream).
        out_shape=jax.ShapeDtypeStruct((batch_p, pdims[-1]), jnp.float32),
        grid=grid,
        in_specs=in_specs,
        out_specs=out_specs,
        compiler_params=pltpu.CompilerParams(
            dimension_semantics=("parallel",),        # megacore sharding on v7x
        ),
        cost_estimate=pl.CostEstimate(flops=flops,
                                      transcendentals=transcendentals,
                                      bytes_accessed=bytes_accessed),
    )(x_p, *padded_params)

    return out_padded[:batch, :out_dim]


def _init_params(key, h_sizes):
    """Deterministic init mimicking torch.nn.Linear's U(-1/sqrt(in), 1/sqrt(in))."""
    weights, biases = [], []
    for k in range(len(h_sizes) - 1):
        fan_in, fan_out = h_sizes[k], h_sizes[k + 1]
        key, kw, kb = jax.random.split(key, 3)
        bound = 1.0 / jnp.sqrt(fan_in)
        w = jax.random.uniform(kw, (fan_in, fan_out), jnp.float32, -bound, bound)
        b = jax.random.uniform(kb, (1, fan_out), jnp.float32, -bound, bound)
        weights.append(w)
        biases.append(b)
    return weights, biases


def _reference(x, weights, biases, mode="inference", matmul_dtype=jnp.bfloat16):
    """Pure-JAX reference with the same matmul dtype policy as the kernel."""
    h = x.astype(matmul_dtype)
    for w, b in zip(weights, biases):
        h = jnp.dot(h.astype(matmul_dtype), w.astype(matmul_dtype),
                    preferred_element_type=jnp.float32) + b.reshape(1, -1).astype(jnp.float32)
        h = jnp.where(h >= 0, h, 0.01 * h)
    if mode == "inference":
        return jax.nn.softmax(h, axis=-1)
    elif mode == "self_train":
        return jax.nn.log_softmax(h, axis=-1)
    return h


if __name__ == "__main__":
    # Module-default MLP sizes; batch = 2 x the module's predict batch_size of 128.
    h_sizes = [768, 256, 64, 2]
    batch = 256

    key = jax.random.PRNGKey(0)
    key, kx = jax.random.split(key)
    x = jax.random.normal(kx, (batch, h_sizes[0]), jnp.float32)
    weights, biases = _init_params(key, h_sizes)

    # Pad + cast the params once (hoisted out of the jitted forward path).
    prepared = [jax.block_until_ready(p) for p in prepare_params(weights, biases)]

    run = jax.jit(functools.partial(feed_forward_flexible,
                                    out_dim=h_sizes[-1], mode="inference"))
    out = jax.block_until_ready(run(x, prepared))

    ref = _reference(x, weights, biases, mode="inference")
    assert out.shape == (batch, h_sizes[-1])
    assert out.dtype == jnp.float32
    assert jnp.allclose(out, ref, atol=2e-3, rtol=2e-3), "inference mismatch vs JAX reference"
    assert jnp.allclose(jnp.sum(out, axis=-1), 1.0, atol=1e-3), "probabilities must sum to 1"

    run_st = jax.jit(functools.partial(feed_forward_flexible,
                                       out_dim=h_sizes[-1], mode="self_train"))
    out_st = jax.block_until_ready(run_st(x, prepared))
    ref_st = _reference(x, weights, biases, mode="self_train")
    assert jnp.allclose(out_st, ref_st, atol=2e-3, rtol=2e-3), "self_train mismatch vs reference"

    print("KERNEL_OK")
</pallas_src>

<mosaic_0001>
module attributes {stable_mosaic.version = 11 : i64} {
  func.func @kernel(%arg0: i32, %arg1: memref<256x768xbf16, #tpu.memory_space<vmem>>, %arg2: memref<768x256xbf16, #tpu.memory_space<vmem>>, %arg3: memref<1x256xf32, #tpu.memory_space<vmem>>, %arg4: memref<256x128xbf16, #tpu.memory_space<vmem>>, %arg5: memref<1x128xf32, #tpu.memory_space<vmem>>, %arg6: memref<128x128xbf16, #tpu.memory_space<vmem>>, %arg7: memref<1x128xf32, #tpu.memory_space<vmem>>, %arg8: memref<256x128xf32, #tpu.memory_space<vmem>>) attributes {dimension_semantics = [#tpu.dimension_semantics<parallel>], iteration_bounds = array<i64: 1>, scalar_prefetch = 0 : i64, scratch_operands = 0 : i64, tpu.core_type = #tpu.core_type<tc>, window_params = [{transform_indices = @transform_0, window_bounds = array<i64: 256, 768>}, {pipeline_mode = #tpu.pipeline_mode<synchronous>, transform_indices = @transform_1, window_bounds = array<i64: 768, 256>}, {pipeline_mode = #tpu.pipeline_mode<synchronous>, transform_indices = @transform_2, window_bounds = array<i64: 1, 256>}, {pipeline_mode = #tpu.pipeline_mode<synchronous>, transform_indices = @transform_3, window_bounds = array<i64: 256, 128>}, {pipeline_mode = #tpu.pipeline_mode<synchronous>, transform_indices = @transform_4, window_bounds = array<i64: 1, 128>}, {pipeline_mode = #tpu.pipeline_mode<synchronous>, transform_indices = @transform_5, window_bounds = array<i64: 128, 128>}, {pipeline_mode = #tpu.pipeline_mode<synchronous>, transform_indices = @transform_6, window_bounds = array<i64: 1, 128>}, {transform_indices = @transform_7, window_bounds = array<i64: 256, 128>}]} {
    %c0 = arith.constant 0 : index
    %c0_0 = arith.constant 0 : index
    %0 = vector.load %arg1[%c0, %c0_0] : memref<256x768xbf16, #tpu.memory_space<vmem>>, vector<256x768xbf16>
    %c0_1 = arith.constant 0 : index
    %c0_2 = arith.constant 0 : index
    %1 = vector.load %arg2[%c0_1, %c0_2] : memref<768x256xbf16, #tpu.memory_space<vmem>>, vector<768x256xbf16>
    %c0_3 = arith.constant 0 : index
    %c0_4 = arith.constant 0 : index
    %2 = vector.load %arg3[%c0_3, %c0_4] : memref<1x256xf32, #tpu.memory_space<vmem>>, vector<1x256xf32>
    %cst = arith.constant dense<0.000000e+00> : vector<256x256xf32>
    %3 = tpu.matmul %0, %1, %cst {dimension_numbers = #tpu.dot_dimension_numbers<[1], [0], [0], [1], [0, 0, 1, 1], [], []>} : vector<256x768xbf16>, vector<768x256xbf16>, vector<256x256xf32> -> vector<256x256xf32>
    %4 = vector.broadcast %2 : vector<1x256xf32> to vector<256x256xf32>
    %5 = arith.addf %3, %4 : vector<256x256xf32>
    %cst_5 = arith.constant 0.000000e+00 : f32
    %6 = vector.broadcast %cst_5 : f32 to vector<256x256xf32>
    %7 = arith.cmpf oge, %5, %6 : vector<256x256xf32>
    %cst_6 = arith.constant 0.00999999977 : f32
    %8 = vector.broadcast %cst_6 : f32 to vector<256x256xf32>
    %9 = arith.mulf %8, %5 : vector<256x256xf32>
    %10 = arith.select %7, %5, %9 : vector<256x256xi1>, vector<256x256xf32>
    %c0_7 = arith.constant 0 : index
    %c0_8 = arith.constant 0 : index
    %11 = vector.load %arg4[%c0_7, %c0_8] : memref<256x128xbf16, #tpu.memory_space<vmem>>, vector<256x128xbf16>
    %c0_9 = arith.constant 0 : index
    %c0_10 = arith.constant 0 : index
    %12 = vector.load %arg5[%c0_9, %c0_10] : memref<1x128xf32, #tpu.memory_space<vmem>>, vector<1x128xf32>
    %13 = arith.truncf %10 : vector<256x256xf32> to vector<256x256xbf16>
    %cst_11 = arith.constant dense<0.000000e+00> : vector<256x128xf32>
    %14 = tpu.matmul %13, %11, %cst_11 {dimension_numbers = #tpu.dot_dimension_numbers<[1], [0], [0], [1], [0, 0, 1, 1], [], []>} : vector<256x256xbf16>, vector<256x128xbf16>, vector<256x128xf32> -> vector<256x128xf32>
    %15 = vector.broadcast %12 : vector<1x128xf32> to vector<256x128xf32>
    %16 = arith.addf %14, %15 : vector<256x128xf32>
    %cst_12 = arith.constant 0.000000e+00 : f32
    %17 = vector.broadcast %cst_12 : f32 to vector<256x128xf32>
    %18 = arith.cmpf oge, %16, %17 : vector<256x128xf32>
    %cst_13 = arith.constant 0.00999999977 : f32
    %19 = vector.broadcast %cst_13 : f32 to vector<256x128xf32>
    %20 = arith.mulf %19, %16 : vector<256x128xf32>
    %21 = arith.select %18, %16, %20 : vector<256x128xi1>, vector<256x128xf32>
    %c0_14 = arith.constant 0 : index
    %c0_15 = arith.constant 0 : index
    %22 = vector.load %arg6[%c0_14, %c0_15] : memref<128x128xbf16, #tpu.memory_space<vmem>>, vector<128x128xbf16>
    %c0_16 = arith.constant 0 : index
    %c0_17 = arith.constant 0 : index
    %23 = vector.load %arg7[%c0_16, %c0_17] : memref<1x128xf32, #tpu.memory_space<vmem>>, vector<1x128xf32>
    %24 = arith.truncf %21 : vector<256x128xf32> to vector<256x128xbf16>
    %cst_18 = arith.constant dense<0.000000e+00> : vector<256x128xf32>
    %25 = tpu.matmul %24, %22, %cst_18 {dimension_numbers = #tpu.dot_dimension_numbers<[1], [0], [0], [1], [0, 0, 1, 1], [], []>} : vector<256x128xbf16>, vector<128x128xbf16>, vector<256x128xf32> -> vector<256x128xf32>
    %26 = vector.broadcast %23 : vector<1x128xf32> to vector<256x128xf32>
    %27 = arith.addf %25, %26 : vector<256x128xf32>
    %cst_19 = arith.constant 0.000000e+00 : f32
    %28 = vector.broadcast %cst_19 : f32 to vector<256x128xf32>
    %29 = arith.cmpf oge, %27, %28 : vector<256x128xf32>
    %cst_20 = arith.constant 0.00999999977 : f32
    %30 = vector.broadcast %cst_20 : f32 to vector<256x128xf32>
    %31 = arith.mulf %30, %27 : vector<256x128xf32>
    %32 = arith.select %29, %27, %31 : vector<256x128xi1>, vector<256x128xf32>
    %cst_21 = arith.constant dense<0xFF800000> : vector<256xf32>
    %33 = vector.multi_reduction <maximumf>, %32, %cst_21 [1] : vector<256x128xf32> to vector<256xf32>
    %34 = vector.shape_cast %33 : vector<256xf32> to vector<256x1xf32>
    %35 = vector.broadcast %34 : vector<256x1xf32> to vector<256x128xf32>
    %36 = arith.subf %32, %35 : vector<256x128xf32>
    %37 = math.exp %36 : vector<256x128xf32>
    %cst_22 = arith.constant dense<0.000000e+00> : vector<256xf32>
    %38 = vector.multi_reduction <add>, %37, %cst_22 [1] : vector<256x128xf32> to vector<256xf32>
    %39 = vector.shape_cast %38 : vector<256xf32> to vector<256x1xf32>
    %40 = vector.broadcast %39 : vector<256x1xf32> to vector<256x128xf32>
    %41 = arith.divf %37, %40 : vector<256x128xf32>
    %c0_23 = arith.constant 0 : index
    %c0_24 = arith.constant 0 : index
    %42 = vector.load %arg8[%c0_23, %c0_24] : memref<256x128xf32, #tpu.memory_space<vmem>>, vector<256x128xf32>
    tpu.vector_store %arg8[%c0_23, %c0_24], %41 {strides = array<i32>} : memref<256x128xf32, #tpu.memory_space<vmem>>, vector<256x128xf32>,
    return
  }
  func.func @transform_0(%arg0: i32) -> (i32, i32) {
    %c0_i32 = arith.constant 0 : i32
    %c0_i32_0 = arith.constant 0 : i32
    return %arg0, %c0_i32 : i32, i32
  }
  func.func @transform_1(%arg0: i32) -> (i32, i32) {
    %c0_i32 = arith.constant 0 : i32
    %c0_i32_0 = arith.constant 0 : i32
    %c0_i32_1 = arith.constant 0 : i32
    return %c0_i32, %c0_i32_0 : i32, i32
  }
  func.func @transform_2(%arg0: i32) -> (i32, i32) {
    %c0_i32 = arith.constant 0 : i32
    %c0_i32_0 = arith.constant 0 : i32
    %c0_i32_1 = arith.constant 0 : i32
    return %c0_i32, %c0_i32_0 : i32, i32
  }
  func.func @transform_3(%arg0: i32) -> (i32, i32) {
    %c0_i32 = arith.constant 0 : i32
    %c0_i32_0 = arith.constant 0 : i32
    %c0_i32_1 = arith.constant 0 : i32
    return %c0_i32, %c0_i32_0 : i32, i32
  }
  func.func @transform_4(%arg0: i32) -> (i32, i32) {
    %c0_i32 = arith.constant 0 : i32
    %c0_i32_0 = arith.constant 0 : i32
    %c0_i32_1 = arith.constant 0 : i32
    return %c0_i32, %c0_i32_0 : i32, i32
  }
  func.func @transform_5(%arg0: i32) -> (i32, i32) {
    %c0_i32 = arith.constant 0 : i32
    %c0_i32_0 = arith.constant 0 : i32
    %c0_i32_1 = arith.constant 0 : i32
    return %c0_i32, %c0_i32_0 : i32, i32
  }
  func.func @transform_6(%arg0: i32) -> (i32, i32) {
    %c0_i32 = arith.constant 0 : i32
    %c0_i32_0 = arith.constant 0 : i32
    %c0_i32_1 = arith.constant 0 : i32
    return %c0_i32, %c0_i32_0 : i32, i32
  }
  func.func @transform_7(%arg0: i32) -> (i32, i32) {
    %c0_i32 = arith.constant 0 : i32
    %c0_i32_0 = arith.constant 0 : i32
    return %arg0, %c0_i32 : i32, i32
  }
}

</mosaic_0001>

<bundles_post_ra>
// kernel: feed_forward_flexible.1
= control target key start
LH: loop header
LB: loop body
LE: loop exit
PB: predicated region body
PF: predicated region fallthrough
CT: control target
= control target key end

     0   :  { %s5793_s1 = inlined_call_operand.vmem [shape: bf16[768,256], index: 1, kind: input, shape index: {}]   ;;  %s5794_s0 = inlined_call_operand.vmem [shape: bf16[256,768], index: 0, kind: input, shape index: {}]   ;;  %s5795_s3 = inlined_call_operand.vmem [shape: bf16[256,128], index: 3, kind: input, shape index: {}]   ;;  %s5796_s2 = inlined_call_operand.vmem [shape: f32[1,256], index: 2, kind: input, shape index: {}]   ;;  %s5797_s5 = inlined_call_operand.vmem [shape: bf16[128,128], index: 5, kind: input, shape index: {}]   ;;  %s5798_s4 = inlined_call_operand.vmem [shape: f32[1,128], index: 4, kind: input, shape index: {}]   ;;  %s5799_s6 = inlined_call_operand.vmem [shape: f32[1,128], index: 6, kind: input, shape index: {}]   ;;  %s5800_s7 = inlined_call_operand.vmem [shape: f32[256,128], index: 7, kind: output, shape index: {}]  }
   0x1   :  { %v3680_v0 = vld [vmem:[%s5793_s1 + $0x4] ss:$8 sps:$4 sm:$0xff]   ;;  %v3682_v1 = vld [vmem:[%s5793_s1] ss:$8 sps:$4 sm:$0xff]   ;;  %v3683_v2 = vld [vmem:[%s5793_s1 + $0x14] ss:$8 sps:$4 sm:$0xff]  }
   0x2   :  { %1191 = vmatprep.subr.bf16.mxu0 %v3680_v0  ;;  %v3685_v3 = vld [vmem:[%s5793_s1 + $0x10] ss:$8 sps:$4 sm:$0xff]   ;;  %v3686_v4 = vld [vmem:[%s5793_s1 + $0x24] ss:$8 sps:$4 sm:$0xff]   ;;  %v3688_v5 = vld [vmem:[%s5793_s1 + $0x20] ss:$8 sps:$4 sm:$0xff]  }
   0x3   :  { %1192 = vmatpush1.bf16.msra.mxu0 %v3682_v1  ;;  %v3689_v6 = vld [vmem:[%s5793_s1 + $0x34] ss:$8 sps:$4 sm:$0xff]   ;;  %v3691_v7 = vld [vmem:[%s5793_s1 + $0x30] ss:$8 sps:$4 sm:$0xff]   ;;  %v3692_v8 = vld [vmem:[%s5793_s1 + $0x44] ss:$8 sps:$4 sm:$0xff]  }
   0x4   :  { %1193 = vmatprep.subr.bf16.mxu0 %v3683_v2  ;;  %v3694_v9 = vld [vmem:[%s5793_s1 + $0x40] ss:$8 sps:$4 sm:$0xff]   ;;  %v3695_v10 = vld [vmem:[%s5793_s1 + $0x54] ss:$8 sps:$4 sm:$0xff]   ;;  %v3697_v11 = vld [vmem:[%s5793_s1 + $0x50] ss:$8 sps:$4 sm:$0xff]  }
   0x5   :  { %v3698_v12 = vld [vmem:[%s5793_s1 + $0x64] ss:$8 sps:$4 sm:$0xff]   ;;  %v3700_v14 = vld [vmem:[%s5793_s1 + $0x60] ss:$8 sps:$4 sm:$0xff]   ;;  %v3701_v15 = vld [vmem:[%s5793_s1 + $0x74] ss:$8 sps:$4 sm:$0xff]  }
   0x6   :  { %v3730_v13 = vld [vmem:[%s5794_s0 + $0x4] ss:$24 sps:$4 sm:$0xff]   ;;  %v3703_v16 = vld [vmem:[%s5793_s1 + $0x70] ss:$8 sps:$4 sm:$0xff]   ;;  %v3706_v18 = vld [vmem:[%s5793_s1 + $0x80] ss:$8 sps:$4 sm:$0xff]  }
   0x7   :  { %1194 = vmatpush1.bf16.msra.mxu0 %v3685_v3  ;;  %1223 = vmatprep.mubr.bf16.mxu0 %v3730_v13  ;;  %v3704_v17 = vld [vmem:[%s5793_s1 + $0x84] ss:$8 sps:$4 sm:$0xff]   ;;  %v3707_v19 = vld [vmem:[%s5793_s1 + $0x94] ss:$8 sps:$4 sm:$0xff]   ;;  %v3709_v20 = vld [vmem:[%s5793_s1 + $0x90] ss:$8 sps:$4 sm:$0xff]  }
   0x8   :  { %1195 = vmatprep.subr.bf16.mxu0 %v3686_v4  ;;  %v3710_v21 = vld [vmem:[%s5793_s1 + $0xa4] ss:$8 sps:$4 sm:$0xff]   ;;  %v3712_v22 = vld [vmem:[%s5793_s1 + $0xa0] ss:$8 sps:$4 sm:$0xff]   ;;  %v3713_v23 = vld [vmem:[%s5793_s1 + $0xb4] ss:$8 sps:$4 sm:$0xff]  }
   0x9   :  { %v3715_v24 = vld [vmem:[%s5793_s1 + $0xb0] ss:$8 sps:$4 sm:$0xff]   ;;  %v3716_v25 = vld [vmem:[%s5793_s1 + $0xc4] ss:$8 sps:$4 sm:$0xff]   ;;  %v3718_v26 = vld [vmem:[%s5793_s1 + $0xc0] ss:$8 sps:$4 sm:$0xff]  }
   0xa   :  { %v3719_v27 = vld [vmem:[%s5793_s1 + $0xd4] ss:$8 sps:$4 sm:$0xff]   ;;  %v3721_v28 = vld [vmem:[%s5793_s1 + $0xd0] ss:$8 sps:$4 sm:$0xff]   ;;  %v3722_v29 = vld [vmem:[%s5793_s1 + $0xe4] ss:$8 sps:$4 sm:$0xff]  }
   0xb   :  { %1196 = vmatpush1.bf16.msra.mxu0 %v3688_v5  ;;  %v3724_v30 = vld [vmem:[%s5793_s1 + $0xe0] ss:$8 sps:$4 sm:$0xff]   ;;  %v3725_v31 = vld [vmem:[%s5793_s1 + $0xf4] ss:$8 sps:$4 sm:$0xff]   ;;  %v4259_v32 = vld [vmem:[%s5793_s1 + $0x204] ss:$8 sps:$4 sm:$0xff]  }
   0xc   :  { %1197 = vmatprep.subr.bf16.mxu0 %v3689_v6  ;;  %v4264_v33 = vld [vmem:[%s5793_s1 + $0x200] ss:$8 sps:$4 sm:$0xff]   ;;  %3456 = vmatprep.subr.bf16.mxu1 %v4259_v32  ;;  %v4270_v34 = vld [vmem:[%s5793_s1 + $0x214] ss:$8 sps:$4 sm:$0xff]   ;;  %v3727_v35 = vld [vmem:[%s5793_s1 + $0xf0] ss:$8 sps:$4 sm:$0xff]  }
   0xd   :  { %3472 = vmatpush1.bf16.msra.mxu1 %v4264_v33  ;;  %v4279_v36 = vld [vmem:[%s5793_s1 + $0x210] ss:$8 sps:$4 sm:$0xff]   ;;  %v3733_v37 = vld [vmem:[%s5793_s1 + $0x104] ss:$8 sps:$4 sm:$0xff]   ;;  %v3731_v39 = vld [vmem:[%s5793_s1 + $0x100] ss:$8 sps:$4 sm:$0xff]  }
   0xe   :  { %3457 = vmatprep.subr.bf16.mxu1 %v4270_v34  ;;  %v3728_v38 = vld [vmem:[%s5794_s0] ss:$24 sps:$4 sm:$0xff]   ;;  %v4294_v40 = vld [vmem:[%s5793_s1 + $0x224] ss:$8 sps:$4 sm:$0xff]   ;;  %v3739_v42 = vld [vmem:[%s5793_s1 + $0x114] ss:$8 sps:$4 sm:$0xff]  }
   0xf   :  { %1198 = vmatpush1.bf16.msra.mxu0 %v3691_v7  ;;  %v3734_v41 = vld [vmem:[%s5794_s0 + $0x34] ss:$24 sps:$4 sm:$0xff]   ;;  %v4307_v43 = vld [vmem:[%s5793_s1 + $0x220] ss:$8 sps:$4 sm:$0xff]   ;;  %v3737_v45 = vld [vmem:[%s5793_s1 + $0x110] ss:$8 sps:$4 sm:$0xff]  }
  0x10   :  { %1199 = vmatprep.subr.bf16.mxu0 %v3692_v8  ;;  %v4312_v44 = vld [vmem:[%s5793_s1 + $0x234] ss:$8 sps:$4 sm:$0xff]   ;;  %v3745_v46 = vld [vmem:[%s5793_s1 + $0x124] ss:$8 sps:$4 sm:$0xff]   ;;  %v4324_v47 = vld [vmem:[%s5793_s1 + $0x230] ss:$8 sps:$4 sm:$0xff]  }
  0x11   :  { %3473 = vmatpush1.bf16.msra.mxu1 %v4279_v36  ;;  %v4330_v48 = vld [vmem:[%s5793_s1 + $0x244] ss:$8 sps:$4 sm:$0xff]   ;;  %v3736_v49 = vld [vmem:[%s5794_s0 + $0x30] ss:$24 sps:$4 sm:$0xff]   ;;  %v3751_v52 = vld [vmem:[%s5793_s1 + $0x134] ss:$8 sps:$4 sm:$0xff]  }
  0x12   :  { %3458 = vmatprep.subr.bf16.mxu1 %v4294_v40  ;;  %v3740_v50 = vld [vmem:[%s5794_s0 + $0x64] ss:$24 sps:$4 sm:$0xff]   ;;  %v3743_v51 = vld [vmem:[%s5793_s1 + $0x120] ss:$8 sps:$4 sm:$0xff]   ;;  %v3749_v55 = vld [vmem:[%s5793_s1 + $0x130] ss:$8 sps:$4 sm:$0xff]  }
  0x13   :  { %1200 = vmatpush1.bf16.msra.mxu0 %v3694_v9  ;;  %v4348_v53 = vld [vmem:[%s5793_s1 + $0x240] ss:$8 sps:$4 sm:$0xff]   ;;  %v4354_v54 = vld [vmem:[%s5793_s1 + $0x254] ss:$8 sps:$4 sm:$0xff]   ;;  %v3757_v56 = vld [vmem:[%s5793_s1 + $0x144] ss:$8 sps:$4 sm:$0xff]  }
  0x14   :  { %1201 = vmatprep.subr.bf16.mxu0 %v3695_v10  ;;  %v4366_v57 = vld [vmem:[%s5793_s1 + $0x250] ss:$8 sps:$4 sm:$0xff]   ;;  %v4372_v58 = vld [vmem:[%s5793_s1 + $0x264] ss:$8 sps:$4 sm:$0xff]   ;;  %v3755_v61 = vld [vmem:[%s5793_s1 + $0x140] ss:$8 sps:$4 sm:$0xff]  }
  0x15   :  { %3474 = vmatpush1.bf16.msra.mxu1 %v4307_v43  ;;  %v3742_v59 = vld [vmem:[%s5794_s0 + $0x60] ss:$24 sps:$4 sm:$0xff]   ;;  %v3746_v60 = vld [vmem:[%s5794_s0 + $0x94] ss:$24 sps:$4 sm:$0xff]   ;;  %v3748_v3 = vld [vmem:[%s5794_s0 + $0x90] ss:$24 sps:$4 sm:$0xff]  }
  0x16   :  { %3459 = vmatprep.subr.bf16.mxu1 %v4312_v44  ;;  %v3763_v62 = vld [vmem:[%s5793_s1 + $0x154] ss:$8 sps:$4 sm:$0xff]   ;;  %v4390_v63 = vld [vmem:[%s5793_s1 + $0x260] ss:$8 sps:$4 sm:$0xff]   ;;  %v3761_v1 = vld [vmem:[%s5793_s1 + $0x150] ss:$8 sps:$4 sm:$0xff]  }
  0x17   :  { %1202 = vmatpush1.bf16.msra.mxu0 %v3697_v11  ;;  %v4396_v0 = vld [vmem:[%s5793_s1 + $0x274] ss:$8 sps:$4 sm:$0xff]   ;;  %v3769_v2 = vld [vmem:[%s5793_s1 + $0x164] ss:$8 sps:$4 sm:$0xff]   ;;  %v4411_v4 = vld [vmem:[%s5793_s1 + $0x270] ss:$8 sps:$4 sm:$0xff]  }
  0x18   :  { %1203 = vmatprep.subr.bf16.mxu0 %v3698_v12  ;;  %v3752_v5 = vld [vmem:[%s5794_s0 + $0xc4] ss:$24 sps:$4 sm:$0xff]   ;;  %v3767_v7 = vld [vmem:[%s5793_s1 + $0x160] ss:$8 sps:$4 sm:$0xff]   ;;  %v3773_v11 = vld [vmem:[%s5793_s1 + $0x170] ss:$8 sps:$4 sm:$0xff]  }
  0x19   :  { %3475 = vmatpush1.bf16.msra.mxu1 %v4324_v47  ;;  %v4420_v6 = vld [vmem:[%s5793_s1 + $0x284] ss:$8 sps:$4 sm:$0xff]   ;;  %v3775_v8 = vld [vmem:[%s5793_s1 + $0x174] ss:$8 sps:$4 sm:$0xff]   ;;  %v4431_v9 = vld [vmem:[%s5793_s1 + $0x280] ss:$8 sps:$4 sm:$0xff]  }
  0x1a   :  { %3460 = vmatprep.subr.bf16.mxu1 %v4330_v48  ;;  %v4436_v10 = vld [vmem:[%s5793_s1 + $0x294] ss:$8 sps:$4 sm:$0xff]   ;;  %v3781_v12 = vld [vmem:[%s5793_s1 + $0x184] ss:$8 sps:$4 sm:$0xff]   ;;  %v4449_v13 = vld [vmem:[%s5793_s1 + $0x290] ss:$8 sps:$4 sm:$0xff]  }
  0x1b   :  { %1204 = vmatpush1.bf16.msra.mxu0 %v3700_v14  ;;  %v4454_v14 = vld [vmem:[%s5793_s1 + $0x2a4] ss:$8 sps:$4 sm:$0xff]  }
  0x1c   :  { %1205 = vmatprep.subr.bf16.mxu0 %v3701_v15  ;;  %v3754_v15 = vld [vmem:[%s5794_s0 + $0xc0] ss:$24 sps:$4 sm:$0xff]  }
  0x1d   :  { %3476 = vmatpush1.bf16.msra.mxu1 %v4348_v53 }
  0x1e   :  { %3461 = vmatprep.subr.bf16.mxu1 %v4354_v54 }
  0x1f   :  { %1206 = vmatpush1.bf16.msra.mxu0 %v3703_v16  ;;  %v3758_v16 = vld [vmem:[%s5794_s0 + $0xf4] ss:$24 sps:$4 sm:$0xff]  }
  0x20   :  { %1207 = vmatprep.subr.bf16.mxu0 %v3704_v17  ;;  %v3779_v17 = vld [vmem:[%s5793_s1 + $0x180] ss:$8 sps:$4 sm:$0xff]  }
  0x21   :  { %3477 = vmatpush1.bf16.msra.mxu1 %v4366_v57 }
  0x22   :  { %3462 = vmatprep.subr.bf16.mxu1 %v4372_v58 }
  0x23   :  { %1208 = vmatpush1.bf16.msra.mxu0 %v3706_v18  ;;  %v3787_v18 = vld [vmem:[%s5793_s1 + $0x194] ss:$8 sps:$4 sm:$0xff]  }
  0x24   :  { %1209 = vmatprep.subr.bf16.mxu0 %v3707_v19  ;;  %v4473_v19 = vld [vmem:[%s5793_s1 + $0x2a0] ss:$8 sps:$4 sm:$0xff]  }
  0x25   :  { %3478 = vmatpush1.bf16.msra.mxu1 %v4390_v63 }
  0x26   :  { %3463 = vmatprep.subr.bf16.mxu1 %v4396_v0 }
  0x27   :  { %1210 = vmatpush1.bf16.msra.mxu0 %v3709_v20  ;;  %v4478_v20 = vld [vmem:[%s5793_s1 + $0x2b4] ss:$8 sps:$4 sm:$0xff]  }
  0x28   :  { %1211 = vmatprep.subr.bf16.mxu0 %v3710_v21  ;;  %v3785_v21 = vld [vmem:[%s5793_s1 + $0x190] ss:$8 sps:$4 sm:$0xff]  }
  0x29   :  { %3479 = vmatpush1.bf16.msra.mxu1 %v4411_v4 }
  0x2a   :  { %3464 = vmatprep.subr.bf16.mxu1 %v4420_v6 }
  0x2b   :  { %1212 = vmatpush1.bf16.msra.mxu0 %v3712_v22  ;;  %v3889_v22 = vld [vmem:[%s5794_s0 + $0xd4] ss:$24 sps:$4 sm:$0xff]  }
  0x2c   :  { %1213 = vmatprep.subr.bf16.mxu0 %v3713_v23  ;;  %v3793_v23 = vld [vmem:[%s5793_s1 + $0x1a4] ss:$8 sps:$4 sm:$0xff]   ;;  %1649 = vmatprep.mubr.bf16.mxu1 %v3889_v22  ;;  %v3796_v22 = vld [vmem:[%s5794_s0 + $0x210] ss:$24 sps:$4 sm:$0xff]  }
  0x2d   :  { %3480 = vmatpush1.bf16.msra.mxu1 %v4431_v9 }
  0x2e   :  { %3465 = vmatprep.subr.bf16.mxu1 %v4436_v10 }
  0x2f   :  { %1214 = vmatpush1.bf16.msra.mxu0 %v3715_v24  ;;  %v4494_v24 = vld [vmem:[%s5793_s1 + $0x2b0] ss:$8 sps:$4 sm:$0xff]  }
  0x30   :  { %1215 = vmatprep.subr.bf16.mxu0 %v3716_v25  ;;  %v4499_v25 = vld [vmem:[%s5793_s1 + $0x2c4] ss:$8 sps:$4 sm:$0xff]  }
  0x31   :  { %3481 = vmatpush1.bf16.msra.mxu1 %v4449_v13 }
  0x32   :  { %3466 = vmatprep.subr.bf16.mxu1 %v4454_v14 }
  0x33   :  { %1216 = vmatpush1.bf16.msra.mxu0 %v3718_v26  ;;  %v3760_v26 = vld [vmem:[%s5794_s0 + $0xf0] ss:$24 sps:$4 sm:$0xff]  }
  0x34   :  { %1217 = vmatprep.subr.bf16.mxu0 %v3719_v27  ;;  %v3764_v27 = vld [vmem:[%s5794_s0 + $0x124] ss:$24 sps:$4 sm:$0xff]  }
  0x35   :  { %3482 = vmatpush1.bf16.msra.mxu1 %v4473_v19 }
  0x36   :  { %3467 = vmatprep.subr.bf16.mxu1 %v4478_v20 }
  0x37   :  { %1218 = vmatpush1.bf16.msra.mxu0 %v3721_v28  ;;  %v3791_v28 = vld [vmem:[%s5793_s1 + $0x1a0] ss:$8 sps:$4 sm:$0xff]  }
  0x38   :  { %1219 = vmatprep.subr.bf16.mxu0 %v3722_v29  ;;  %v3799_v29 = vld [vmem:[%s5793_s1 + $0x1b4] ss:$8 sps:$4 sm:$0xff]  }
  0x39   :  { %3483 = vmatpush1.bf16.msra.mxu1 %v4494_v24 }
  0x3a   :  { %3468 = vmatprep.subr.bf16.mxu1 %v4499_v25 }
  0x3b   :  { %1220 = vmatpush1.bf16.msra.mxu0 %v3724_v30  ;;  %v4518_v30 = vld [vmem:[%s5793_s1 + $0x2c0] ss:$8 sps:$4 sm:$0xff]  }
  0x3c   :  { %1221 = vmatprep.subr.bf16.mxu0 %v3725_v31  ;;  %v3797_v31 = vld [vmem:[%s5793_s1 + $0x1b0] ss:$8 sps:$4 sm:$0xff]  }
  0x3d   :  { %3484 = vmatpush1.bf16.msra.mxu1 %v4518_v30 }
  0x3f   :  { %1222 = vmatpush1.bf16.msra.mxu0 %v3727_v35  ;;  %v4528_v35 = vld [vmem:[%s5793_s1 + $0x2d4] ss:$8 sps:$4 sm:$0xff]  }
  0x40   :  { %1384 = vmatprep.subr.bf16.mxu0 %v3733_v37  ;;  %v3805_v37 = vld [vmem:[%s5793_s1 + $0x1c4] ss:$8 sps:$4 sm:$0xff]   ;;  %3469 = vmatprep.subr.bf16.mxu1 %v4528_v35 }
  0x42   :  { %1224 = vmatmul.mubr.bf16.vlgmr.msra.gmra.mrb[0].mxu0 %v3728_v38  ;;  %v4536_v38 = vld [vmem:[%s5793_s1 + $0x2d0] ss:$8 sps:$4 sm:$0xff]  }
  0x43   :  { %1385 = vmatpush1.bf16.msra.mxu0 %v3731_v39  ;;  %1233 = vmatprep.mubr.bf16.mxu0 %v3734_v41  ;;  %v4541_v39 = vld [vmem:[%s5793_s1 + $0x2e4] ss:$8 sps:$4 sm:$0xff]   ;;  %v3766_v41 = vld [vmem:[%s5794_s0 + $0x120] ss:$24 sps:$4 sm:$0xff]  }
  0x44   :  { %1386 = vmatprep.subr.bf16.mxu0 %v3739_v42  ;;  %v3770_v42 = vld [vmem:[%s5794_s0 + $0x154] ss:$24 sps:$4 sm:$0xff]   ;;  %3485 = vmatpush1.bf16.msra.mxu1 %v4536_v38 }
  0x45   :  { %3470 = vmatprep.subr.bf16.mxu1 %v4541_v39 }
  0x47   :  { %1387 = vmatpush1.bf16.msra.mxu0 %v3737_v45  ;;  %v3803_v45 = vld [vmem:[%s5793_s1 + $0x1c0] ss:$8 sps:$4 sm:$0xff]  }
  0x48   :  { %1388 = vmatprep.subr.bf16.mxu0 %v3745_v46  ;;  %v3817_v46 = vld [vmem:[%s5793_s1 + $0x1d4] ss:$8 sps:$4 sm:$0xff]  }
  0x4a   :  { %1234 = vmatmul.mubr.bf16.gmra.mrb[4].mxu0 %v3736_v49  ;;  %v4561_v49 = vld [vmem:[%s5793_s1 + $0x2e0] ss:$8 sps:$4 sm:$0xff]  }
  0x4b   :  { %1243 = vmatprep.mubr.bf16.mxu0 %v3740_v50  ;;  %1389 = vmatpush1.bf16.msra.mxu0 %v3743_v51  ;;  %v4567_v50 = vld [vmem:[%s5793_s1 + $0x2f4] ss:$8 sps:$4 sm:$0xff]   ;;  %v3815_v51 = vld [vmem:[%s5793_s1 + $0x1d0] ss:$8 sps:$4 sm:$0xff]  }
  0x4c   :  { %1390 = vmatprep.subr.bf16.mxu0 %v3751_v52  ;;  %v3829_v52 = vld [vmem:[%s5793_s1 + $0x1e4] ss:$8 sps:$4 sm:$0xff]   ;;  %3486 = vmatpush1.bf16.msra.mxu1 %v4561_v49 }
  0x4d   :  { %3471 = vmatprep.subr.bf16.mxu1 %v4567_v50 }
  0x4f   :  { %1391 = vmatpush1.bf16.msra.mxu0 %v3749_v55  ;;  %v4579_v55 = vld [vmem:[%s5793_s1 + $0x2f0] ss:$8 sps:$4 sm:$0xff]  }
  0x50   :  { %1392 = vmatprep.subr.bf16.mxu0 %v3757_v56  ;;  %v3772_v56 = vld [vmem:[%s5794_s0 + $0x150] ss:$24 sps:$4 sm:$0xff]   ;;  %3487 = vmatpush1.bf16.msra.mxu1 %v4579_v55 }
  0x52   :  { %1244 = vmatmul.mubr.bf16.gmra.mrb[8].mxu0 %v3742_v59  ;;  %v3776_v59 = vld [vmem:[%s5794_s0 + $0x184] ss:$24 sps:$4 sm:$0xff]  }
  0x53   :  { %1253 = vmatprep.mubr.bf16.mxu0 %v3746_v60  ;;  %1393 = vmatpush1.bf16.msra.mxu0 %v3755_v61  ;;  %v3827_v60 = vld [vmem:[%s5793_s1 + $0x1e0] ss:$8 sps:$4 sm:$0xff]   ;;  %v3841_v61 = vld [vmem:[%s5793_s1 + $0x1f4] ss:$8 sps:$4 sm:$0xff]  }
  0x54   :  { %1394 = vmatprep.subr.bf16.mxu0 %v3763_v62  ;;  %v3887_v62 = vld [vmem:[%s5794_s0 + $0xd0] ss:$24 sps:$4 sm:$0xff]  }
  0x55   :  { %1650 = vmatmul.mubr.bf16.vlgmr.msra.gmra.mrb[0].mxu1 %v3887_v62  ;;  %v3937_v62 = vld [vmem:[%s5794_s0 + $0x250] ss:$24 sps:$4 sm:$0xff]  }
  0x57   :  { %1395 = vmatpush1.bf16.msra.mxu0 %v3761_v1  ;;  %v3893_v1 = vld [vmem:[%s5794_s0 + $0x104] ss:$24 sps:$4 sm:$0xff]  }
  0x58   :  { %1396 = vmatprep.subr.bf16.mxu0 %v3769_v2  ;;  %v3839_v2 = vld [vmem:[%s5793_s1 + $0x1f0] ss:$8 sps:$4 sm:$0xff]   ;;  %1659 = vmatprep.mubr.bf16.mxu1 %v3893_v1  ;;  %v3941_v1 = vld [vmem:[%s5794_s0 + $0x284] ss:$24 sps:$4 sm:$0xff]  }
  0x5a   :  { %1254 = vmatmul.mubr.bf16.gmra.mrb[12].mxu0 %v3748_v3  ;;  %v3778_v3 = vld [vmem:[%s5794_s0 + $0x180] ss:$24 sps:$4 sm:$0xff]  }
  0x5b   :  { %1263 = vmatprep.mubr.bf16.mxu0 %v3752_v5  ;;  %1397 = vmatpush1.bf16.msra.mxu0 %v3767_v7  ;;  %v3782_v5 = vld [vmem:[%s5794_s0 + $0x1b4] ss:$24 sps:$4 sm:$0xff]   ;;  %v3895_v7 = vld [vmem:[%s5794_s0 + $0x100] ss:$24 sps:$4 sm:$0xff]  }
  0x5c   :  { %1398 = vmatprep.subr.bf16.mxu0 %v3775_v8  ;;  %v3899_v8 = vld [vmem:[%s5794_s0 + $0x134] ss:$24 sps:$4 sm:$0xff]  }
  0x5d   :  { %1660 = vmatmul.mubr.bf16.gmra.mrb[4].mxu1 %v3895_v7  ;;  %v3947_v7 = vld [vmem:[%s5794_s0 + $0x2b4] ss:$24 sps:$4 sm:$0xff]  }
  0x5e   :  { %1669 = vmatprep.mubr.bf16.mxu1 %v3899_v8  ;;  %v3859_v8 = vld [vmem:[%s5794_s0 + $0x38] ss:$24 sps:$4 sm:$0xff]  }
  0x5f   :  { %1399 = vmatpush1.bf16.msra.mxu0 %v3773_v11  ;;  %v3784_v11 = vld [vmem:[%s5794_s0 + $0x1b0] ss:$24 sps:$4 sm:$0xff]  }
  0x60   :  { %1400 = vmatprep.subr.bf16.mxu0 %v3781_v12  ;;  %v3901_v12 = vld [vmem:[%s5794_s0 + $0x130] ss:$24 sps:$4 sm:$0xff]  }
  0x62   :  { %1264 = vmatmul.mubr.bf16.gmra.mrb[16].mxu0 %v3754_v15  ;;  %v3905_v15 = vld [vmem:[%s5794_s0 + $0x164] ss:$24 sps:$4 sm:$0xff]  }
  0x63   :  { %1273 = vmatprep.mubr.bf16.mxu0 %v3758_v16  ;;  %1401 = vmatpush1.bf16.msra.mxu0 %v3779_v17  ;;  %v3790_v16 = vld [vmem:[%s5794_s0 + $0x1e0] ss:$24 sps:$4 sm:$0xff]   ;;  %v3794_v17 = vld [vmem:[%s5794_s0 + $0x214] ss:$24 sps:$4 sm:$0xff]  }
  0x64   :  { %1402 = vmatprep.subr.bf16.mxu0 %v3787_v18  ;;  %v3907_v18 = vld [vmem:[%s5794_s0 + $0x160] ss:$24 sps:$4 sm:$0xff]  }
  0x65   :  { %1670 = vmatmul.mubr.bf16.gmra.mrb[8].mxu1 %v3901_v12  ;;  %v3959_v12 = vld [vmem:[%s5794_s0 + $0x44] ss:$24 sps:$4 sm:$0xff]  }
  0x66   :  { %1679 = vmatprep.mubr.bf16.mxu1 %v3905_v15  ;;  %v3961_v15 = vld [vmem:[%s5794_s0 + $0x40] ss:$24 sps:$4 sm:$0xff]  }
  0x67   :  { %1403 = vmatpush1.bf16.msra.mxu0 %v3785_v21  ;;  %v3911_v21 = vld [vmem:[%s5794_s0 + $0x194] ss:$24 sps:$4 sm:$0xff]  }
  0x68   :  { %1404 = vmatprep.subr.bf16.mxu0 %v3793_v23  ;;  %v3800_v23 = vld [vmem:[%s5794_s0 + $0x244] ss:$24 sps:$4 sm:$0xff]  }
  0x6a   :  { %1274 = vmatmul.mubr.bf16.gmra.mrb[20].mxu0 %v3760_v26  ;;  %v3913_v26 = vld [vmem:[%s5794_s0 + $0x190] ss:$24 sps:$4 sm:$0xff]  }
  0x6b   :  { %1283 = vmatprep.mubr.bf16.mxu0 %v3764_v27  ;;  %1405 = vmatpush1.bf16.msra.mxu0 %v3791_v28  ;;  %v3917_v27 = vld [vmem:[%s5794_s0 + $0x1c4] ss:$24 sps:$4 sm:$0xff]   ;;  %v3802_v28 = vld [vmem:[%s5794_s0 + $0x240] ss:$24 sps:$4 sm:$0xff]  }
  0x6c   :  { %1406 = vmatprep.subr.bf16.mxu0 %v3799_v29  ;;  %v3811_v29 = vld [vmem:[%s5794_s0 + $0x274] ss:$24 sps:$4 sm:$0xff]  }
  0x6d   :  { %1680 = vmatmul.mubr.bf16.gmra.mrb[12].mxu1 %v3907_v18  ;;  %v3969_v18 = vld [vmem:[%s5795_s3] sm:$0xff]  }
  0x6e   :  { %1689 = vmatprep.mubr.bf16.mxu1 %v3911_v21  ;;  %v3964_v21 = vld [vmem:[%s5794_s0 + $0x70] ss:$24 sps:$4 sm:$0xff]  }
  0x6f   :  { %1407 = vmatpush1.bf16.msra.mxu0 %v3797_v31  ;;  %v3919_v31 = vld [vmem:[%s5794_s0 + $0x1c0] ss:$24 sps:$4 sm:$0xff]  }
  0x70   :  { %1408 = vmatprep.subr.bf16.mxu0 %v3805_v37  ;;  %v3923_v37 = vld [vmem:[%s5794_s0 + $0x1f4] ss:$24 sps:$4 sm:$0xff]  }
  0x72   :  { %1284 = vmatmul.mubr.bf16.gmra.mrb[24].mxu0 %v3766_v41  ;;  %v3814_v41 = vld [vmem:[%s5794_s0 + $0x270] ss:$24 sps:$4 sm:$0xff]  }
  0x73   :  { %1293 = vmatprep.mubr.bf16.mxu0 %v3770_v42  ;;  %1409 = vmatpush1.bf16.msra.mxu0 %v3803_v45  ;;  %v3823_v42 = vld [vmem:[%s5794_s0 + $0x2a4] ss:$24 sps:$4 sm:$0xff]   ;;  %v3925_v45 = vld [vmem:[%s5794_s0 + $0x1f0] ss:$24 sps:$4 sm:$0xff]  }
  0x74   :  { %1410 = vmatprep.subr.bf16.mxu0 %v3817_v46  ;;  %v3929_v46 = vld [vmem:[%s5794_s0 + $0x224] ss:$24 sps:$4 sm:$0xff]  }
  0x75   :  { %1690 = vmatmul.mubr.bf16.gmra.mrb[16].mxu1 %v3913_v26 }
  0x76   :  { %1699 = vmatprep.mubr.bf16.mxu1 %v3917_v27  ;;  %v3971_v27 = vld [vmem:[%s5795_s3 + $0x8] sm:$0xff]  }
  0x77   :  { %1411 = vmatpush1.bf16.msra.mxu0 %v3815_v51  ;;  %v3826_v51 = vld [vmem:[%s5794_s0 + $0x2a0] ss:$24 sps:$4 sm:$0xff]  }
  0x78   :  { %1412 = vmatprep.subr.bf16.mxu0 %v3829_v52  ;;  %v3835_v52 = vld [vmem:[%s5794_s0 + $0x2d4] ss:$24 sps:$4 sm:$0xff]  }
  0x7a   :  { %1294 = vmatmul.mubr.bf16.gmra.mrb[28].mxu0 %v3772_v56  ;;  %v3931_v56 = vld [vmem:[%s5794_s0 + $0x220] ss:$24 sps:$4 sm:$0xff]  }
  0x7b   :  { %1303 = vmatprep.mubr.bf16.mxu0 %v3776_v59  ;;  %1413 = vmatpush1.bf16.msra.mxu0 %v3827_v60  ;;  %v3935_v59 = vld [vmem:[%s5794_s0 + $0x254] ss:$24 sps:$4 sm:$0xff]   ;;  %v3838_v60 = vld [vmem:[%s5794_s0 + $0x2d0] ss:$24 sps:$4 sm:$0xff]  }
  0x7c   :  { %1414 = vmatprep.subr.bf16.mxu0 %v3841_v61  ;;  %v3849_v61 = vld [vmem:[%s5794_s0 + $0xc] ss:$24 sps:$4 sm:$0xff]  }
  0x7d   :  { %1700 = vmatmul.mubr.bf16.gmra.mrb[20].mxu1 %v3919_v31 }
  0x7e   :  { %1709 = vmatprep.mubr.bf16.mxu1 %v3923_v37  ;;  %v3967_v37 = vld [vmem:[%s5794_s0 + $0xa0] ss:$24 sps:$4 sm:$0xff]  }
  0x7f   :  { %1415 = vmatpush1.bf16.msra.mxu0 %v3839_v2  ;;  %v3847_v2 = vld [vmem:[%s5794_s0 + $0x8] ss:$24 sps:$4 sm:$0xff]  }
  0x80   :  { %1577 = vmatprep.subr.bf16.mxu0 %v4259_v32  ;;  %v3788_v32 = vld [vmem:[%s5794_s0 + $0x1e4] ss:$24 sps:$4 sm:$0xff]  }
  0x82   :  { %1304 = vmatmul.mubr.bf16.gmra.mrb[32].mxu0 %v3778_v3  ;;  %v3856_v3 = vld [vmem:[%s5794_s0 + $0x3c] ss:$24 sps:$4 sm:$0xff]  }
  0x83   :  { %1313 = vmatprep.mubr.bf16.mxu0 %v3782_v5  ;;  %v3943_v5 = vld [vmem:[%s5794_s0 + $0x280] ss:$24 sps:$4 sm:$0xff]  }
  0x85   :  { %1710 = vmatmul.mubr.bf16.gmra.mrb[24].mxu1 %v3925_v45 }
  0x86   :  { %1719 = vmatprep.mubr.bf16.mxu1 %v3929_v46 }
  0x8a   :  { %1314 = vmatmul.mubr.bf16.gmra.mrb[36].mxu0 %v3784_v11  ;;  %v3865_v11 = vld [vmem:[%s5794_s0 + $0x6c] ss:$24 sps:$4 sm:$0xff]  }
  0x8b   :  { %1323 = vmatprep.mubr.bf16.mxu0 %v3788_v32  ;;  %v3956_v32 = vld [vmem:[%s5794_s0 + $0x10] ss:$24 sps:$4 sm:$0xff]  }
  0x8d   :  { %1720 = vmatmul.mubr.bf16.gmra.mrb[28].mxu1 %v3931_v56 }
  0x8e   :  { %1729 = vmatprep.mubr.bf16.mxu1 %v3935_v59 }
  0x92   :  { %1324 = vmatmul.mubr.bf16.gmra.mrb[40].mxu0 %v3790_v16  ;;  %v3962_v16 = vld [vmem:[%s5794_s0 + $0x74] ss:$24 sps:$4 sm:$0xff]  }
  0x93   :  { %1333 = vmatprep.mubr.bf16.mxu0 %v3794_v17  ;;  %v3968_v17 = vld [vmem:[%s5795_s3 + $0x40] sm:$0xff]  }
  0x94   :  { %3272 = vmatprep.subr.bf16.mxu1 %v3968_v17 }
  0x95   :  { %1730 = vmatmul.mubr.bf16.gmra.mrb[32].mxu1 %v3937_v62  ;;  %v3974_v62 = vld [vmem:[%s5795_s3 + $0x58] sm:$0xff]  }
  0x96   :  { %1739 = vmatprep.mubr.bf16.mxu1 %v3941_v1  ;;  %3273 = vmatpush3.bf16.msra.mxu1 %v3969_v18 }
  0x9a   :  { %1334 = vmatmul.mubr.bf16.gmra.mrb[44].mxu0 %v3796_v22  ;;  %v3965_v22 = vld [vmem:[%s5794_s0 + $0xa4] ss:$24 sps:$4 sm:$0xff]  }
  0x9b   :  { %1343 = vmatprep.mubr.bf16.mxu0 %v3800_v23  ;;  %v3970_v23 = vld [vmem:[%s5795_s3 + $0x48] sm:$0xff]  }
  0x9c   :  { %3274 = vmatprep.subr.bf16.mxu1 %v3970_v23 }
  0x9d   :  { %1740 = vmatmul.mubr.bf16.gmra.mrb[36].mxu1 %v3943_v5 }
  0x9e   :  { %1749 = vmatprep.mubr.bf16.mxu1 %v3947_v7  ;;  %3275 = vmatpush3.bf16.msra.mxu1 %v3971_v27 }
  0xa2   :  { %1344 = vmatmul.mubr.bf16.gmra.mrb[48].mxu0 %v3802_v28 }
  0xa3   :  { %1353 = vmatprep.mubr.bf16.mxu0 %v3811_v29 }
  0xaa   :  { %1354 = vmatmul.mubr.bf16.gmra.mrb[52].mxu0 %v3814_v41 }
  0xab   :  { %1363 = vmatprep.mubr.bf16.mxu0 %v3823_v42 }
  0xb2   :  { %1364 = vmatmul.mubr.bf16.gmra.mrb[56].mxu0 %v3826_v51  ;;  %v3972_v51 = vld [vmem:[%s5795_s3 + $0x50] sm:$0xff]  }
  0xb3   :  { %1373 = vmatprep.mubr.bf16.mxu0 %v3835_v52  ;;  %v3973_v52 = vld [vmem:[%s5795_s3 + $0x10] sm:$0xff]   ;;  %3276 = vmatprep.subr.bf16.mxu1 %v3972_v51 }
  0xb4   :  { %3277 = vmatpush3.bf16.msra.mxu1 %v3973_v52 }
  0xb5   :  { %3278 = vmatprep.subr.bf16.mxu1 %v3974_v62 }
  0xba   :  { %1374 = vmatmul.mubr.bf16.gmra.mrb[60].mxu0 %v3838_v60 }
  0xbb   :  { %1416 = vmatprep.mubr.bf16.mxu0 %v3849_v61 }
  0xc2   :  { %1417 = vmatmul.mubr.bf16.vlgmr.msra.gmra.mrb[0].mxu0 %v3847_v2  ;;  %v3975_v2 = vld [vmem:[%s5795_s3 + $0x18] sm:$0xff]  }
  0xc3   :  { %1578 = vmatpush1.bf16.msra.mxu0 %v4264_v33  ;;  %1426 = vmatprep.mubr.bf16.mxu0 %v3856_v3  ;;  %v3949_v33 = vld [vmem:[%s5794_s0 + $0x2b0] ss:$24 sps:$4 sm:$0xff]  }
  0xc4   :  { %1579 = vmatprep.subr.bf16.mxu0 %v4270_v34  ;;  %v3953_v34 = vld [vmem:[%s5794_s0 + $0x2e4] ss:$24 sps:$4 sm:$0xff]   ;;  %1750 = vmatmul.mubr.bf16.gmra.mrb[40].mxu1 %v3949_v33 }
  0xc5   :  { %1759 = vmatprep.mubr.bf16.mxu1 %v3953_v34  ;;  %3279 = vmatpush3.bf16.msra.mxu1 %v3975_v2 }
  0xc7   :  { %1580 = vmatpush1.bf16.msra.mxu0 %v4279_v36  ;;  %v3868_v36 = vld [vmem:[%s5794_s0 + $0x68] ss:$24 sps:$4 sm:$0xff]  }
  0xc8   :  { %1581 = vmatprep.subr.bf16.mxu0 %v4294_v40  ;;  %v3874_v40 = vld [vmem:[%s5794_s0 + $0x9c] ss:$24 sps:$4 sm:$0xff]  }
  0xca   :  { %1427 = vmatmul.mubr.bf16.gmra.mrb[4].mxu0 %v3859_v8 }
  0xcb   :  { %1436 = vmatprep.mubr.bf16.mxu0 %v3865_v11  ;;  %1582 = vmatpush1.bf16.msra.mxu0 %v4307_v43  ;;  %v3955_v43 = vld [vmem:[%s5794_s0 + $0x2e0] ss:$24 sps:$4 sm:$0xff]  }
  0xcc   :  { %1583 = vmatprep.subr.bf16.mxu0 %v4312_v44  ;;  %1760 = vmatmul.mubr.bf16.gmra.mrb[44].mxu1 %v3955_v43  ;;  %v3877_v44 = vld [vmem:[%s5794_s0 + $0x98] ss:$24 sps:$4 sm:$0xff]  }
  0xcf   :  { %1584 = vmatpush1.bf16.msra.mxu0 %v4324_v47  ;;  %v3883_v47 = vld [vmem:[%s5794_s0 + $0xcc] ss:$24 sps:$4 sm:$0xff]  }
  0xd0   :  { %1585 = vmatprep.subr.bf16.mxu0 %v4330_v48  ;;  %v3886_v48 = vld [vmem:[%s5794_s0 + $0xc8] ss:$24 sps:$4 sm:$0xff]  }
  0xd2   :  { %1437 = vmatmul.mubr.bf16.gmra.mrb[8].mxu0 %v3868_v36  ;;  %v3976_v36 = vld [vmem:[%s5795_s3 + $0x60] sm:$0xff]  }
  0xd3   :  { %1446 = vmatprep.mubr.bf16.mxu0 %v3874_v40  ;;  %1586 = vmatpush1.bf16.msra.mxu0 %v4348_v53  ;;  %v3890_v53 = vld [vmem:[%s5794_s0 + $0xfc] ss:$24 sps:$4 sm:$0xff]   ;;  %v3977_v40 = vld [vmem:[%s5795_s3 + $0x20] sm:$0xff]  }
  0xd4   :  { %1587 = vmatprep.subr.bf16.mxu0 %v4354_v54  ;;  %v3892_v54 = vld [vmem:[%s5794_s0 + $0xf8] ss:$24 sps:$4 sm:$0xff]   ;;  %3280 = vmatprep.subr.bf16.mxu1 %v3976_v36 }
  0xd5   :  { %3281 = vmatpush3.bf16.msra.mxu1 %v3977_v40 }
  0xd7   :  { %1588 = vmatpush1.bf16.msra.mxu0 %v4366_v57  ;;  %v3896_v57 = vld [vmem:[%s5794_s0 + $0x12c] ss:$24 sps:$4 sm:$0xff]  }
  0xd8   :  { %1589 = vmatprep.subr.bf16.mxu0 %v4372_v58  ;;  %v3898_v58 = vld [vmem:[%s5794_s0 + $0x128] ss:$24 sps:$4 sm:$0xff]  }
  0xda   :  { %1447 = vmatmul.mubr.bf16.gmra.mrb[12].mxu0 %v3877_v44 }
  0xdb   :  { %1456 = vmatprep.mubr.bf16.mxu0 %v3883_v47  ;;  %1590 = vmatpush1.bf16.msra.mxu0 %v4390_v63  ;;  %v3902_v63 = vld [vmem:[%s5794_s0 + $0x15c] ss:$24 sps:$4 sm:$0xff]  }
  0xdc   :  { %1591 = vmatprep.subr.bf16.mxu0 %v4396_v0  ;;  %v3904_v0 = vld [vmem:[%s5794_s0 + $0x158] ss:$24 sps:$4 sm:$0xff]  }
  0xdf   :  { %1592 = vmatpush1.bf16.msra.mxu0 %v4411_v4  ;;  %v3908_v4 = vld [vmem:[%s5794_s0 + $0x18c] ss:$24 sps:$4 sm:$0xff]  }
  0xe0   :  { %1593 = vmatprep.subr.bf16.mxu0 %v4420_v6  ;;  %v3910_v6 = vld [vmem:[%s5794_s0 + $0x188] ss:$24 sps:$4 sm:$0xff]  }
  0xe2   :  { %1457 = vmatmul.mubr.bf16.gmra.mrb[16].mxu0 %v3886_v48 }
  0xe3   :  { %1466 = vmatprep.mubr.bf16.mxu0 %v3890_v53  ;;  %1594 = vmatpush1.bf16.msra.mxu0 %v4431_v9  ;;  %v3914_v9 = vld [vmem:[%s5794_s0 + $0x1bc] ss:$24 sps:$4 sm:$0xff]   ;;  %v3978_v53 = vld [vmem:[%s5795_s3 + $0x68] sm:$0xff]  }
  0xe4   :  { %1595 = vmatprep.subr.bf16.mxu0 %v4436_v10  ;;  %v3916_v10 = vld [vmem:[%s5794_s0 + $0x1b8] ss:$24 sps:$4 sm:$0xff]   ;;  %3282 = vmatprep.subr.bf16.mxu1 %v3978_v53 }
  0xe7   :  { %1596 = vmatpush1.bf16.msra.mxu0 %v4449_v13  ;;  %v3920_v13 = vld [vmem:[%s5794_s0 + $0x1ec] ss:$24 sps:$4 sm:$0xff]  }
  0xe8   :  { %1597 = vmatprep.subr.bf16.mxu0 %v4454_v14  ;;  %v3922_v14 = vld [vmem:[%s5794_s0 + $0x1e8] ss:$24 sps:$4 sm:$0xff]  }
  0xea   :  { %1467 = vmatmul.mubr.bf16.gmra.mrb[20].mxu0 %v3892_v54 }
  0xeb   :  { %1476 = vmatprep.mubr.bf16.mxu0 %v3896_v57  ;;  %1598 = vmatpush1.bf16.msra.mxu0 %v4473_v19  ;;  %v3926_v19 = vld [vmem:[%s5794_s0 + $0x21c] ss:$24 sps:$4 sm:$0xff]   ;;  %v3979_v57 = vld [vmem:[%s5795_s3 + $0x28] sm:$0xff]  }
  0xec   :  { %1599 = vmatprep.subr.bf16.mxu0 %v4478_v20  ;;  %v3928_v20 = vld [vmem:[%s5794_s0 + $0x218] ss:$24 sps:$4 sm:$0xff]   ;;  %3283 = vmatpush3.bf16.msra.mxu1 %v3979_v57 }
  0xef   :  { %1600 = vmatpush1.bf16.msra.mxu0 %v4494_v24  ;;  %v3932_v24 = vld [vmem:[%s5794_s0 + $0x24c] ss:$24 sps:$4 sm:$0xff]  }
  0xf0   :  { %1601 = vmatprep.subr.bf16.mxu0 %v4499_v25  ;;  %v3934_v25 = vld [vmem:[%s5794_s0 + $0x248] ss:$24 sps:$4 sm:$0xff]  }
  0xf2   :  { %1477 = vmatmul.mubr.bf16.gmra.mrb[24].mxu0 %v3898_v58 }
  0xf3   :  { %1486 = vmatprep.mubr.bf16.mxu0 %v3902_v63  ;;  %1602 = vmatpush1.bf16.msra.mxu0 %v4518_v30  ;;  %v3938_v30 = vld [vmem:[%s5794_s0 + $0x27c] ss:$24 sps:$4 sm:$0xff]  }
  0xf4   :  { %1603 = vmatprep.subr.bf16.mxu0 %v4528_v35  ;;  %v3940_v35 = vld [vmem:[%s5794_s0 + $0x278] ss:$24 sps:$4 sm:$0xff]  }
  0xf7   :  { %1604 = vmatpush1.bf16.msra.mxu0 %v4536_v38  ;;  %v3944_v38 = vld [vmem:[%s5794_s0 + $0x2ac] ss:$24 sps:$4 sm:$0xff]  }
  0xf8   :  { %1605 = vmatprep.subr.bf16.mxu0 %v4541_v39  ;;  %v3946_v39 = vld [vmem:[%s5794_s0 + $0x2a8] ss:$24 sps:$4 sm:$0xff]  }
  0xfa   :  { %1487 = vmatmul.mubr.bf16.gmra.mrb[28].mxu0 %v3904_v0 }
  0xfb   :  { %1496 = vmatprep.mubr.bf16.mxu0 %v3908_v4  ;;  %1606 = vmatpush1.bf16.msra.mxu0 %v4561_v49  ;;  %v3950_v49 = vld [vmem:[%s5794_s0 + $0x2dc] ss:$24 sps:$4 sm:$0xff]  }
  0xfc   :  { %1607 = vmatprep.subr.bf16.mxu0 %v4567_v50  ;;  %v3952_v50 = vld [vmem:[%s5794_s0 + $0x2d8] ss:$24 sps:$4 sm:$0xff]  }
  0xff   :  { %1608 = vmatpush1.bf16.msra.mxu0 %v4579_v55  ;;  %v3958_v55 = vld [vmem:[%s5794_s0 + $0x14] ss:$24 sps:$4 sm:$0xff]  }
 0x102   :  { %1497 = vmatmul.mubr.bf16.gmra.mrb[32].mxu0 %v3910_v6 }
 0x103   :  { %1506 = vmatprep.mubr.bf16.mxu0 %v3914_v9 }
 0x10a   :  { %1507 = vmatmul.mubr.bf16.gmra.mrb[36].mxu0 %v3916_v10 }
 0x10b   :  { %1516 = vmatprep.mubr.bf16.mxu0 %v3920_v13  ;;  %v3980_v13 = vld [vmem:[%s5795_s3 + $0x70] sm:$0xff]  }
 0x10c   :  { %3284 = vmatprep.subr.bf16.mxu1 %v3980_v13 }
 0x112   :  { %1517 = vmatmul.mubr.bf16.gmra.mrb[40].mxu0 %v3922_v14  ;;  %v3981_v14 = vld [vmem:[%s5795_s3 + $0x30] sm:$0xff]  }
 0x113   :  { %1526 = vmatprep.mubr.bf16.mxu0 %v3926_v19  ;;  %3285 = vmatpush3.bf16.msra.mxu1 %v3981_v14 }
 0x11a   :  { %1527 = vmatmul.mubr.bf16.gmra.mrb[44].mxu0 %v3928_v20 }
 0x11b   :  { %1536 = vmatprep.mubr.bf16.mxu0 %v3932_v24 }
 0x122   :  { %1537 = vmatmul.mubr.bf16.gmra.mrb[48].mxu0 %v3934_v25 }
 0x123   :  { %1546 = vmatprep.mubr.bf16.mxu0 %v3938_v30 }
 0x128   :  { %v4870_v26 = vpop.f32.mrb[0].mxu1 }
 0x129   :  { %v4875_v28 = vpop.f32.mrb[1].mxu1 }
 0x12a   :  { %1547 = vmatmul.mubr.bf16.gmra.mrb[52].mxu0 %v3940_v35  ;;  %v4877_v29 = vpop.f32.mrb[2].mxu1 }
 0x12b   :  { %1556 = vmatprep.mubr.bf16.mxu0 %v3944_v38  ;;  %v4879_v31 = vpop.f32.mrb[3].mxu1 }
 0x130   :  { %v4884_v41 = vpop.f32.mrb[4].mxu1 }
 0x131   :  { %v4886_v42 = vpop.f32.mrb[5].mxu1 }
 0x132   :  { %1557 = vmatmul.mubr.bf16.gmra.mrb[56].mxu0 %v3946_v39  ;;  %v4888_v45 = vpop.f32.mrb[6].mxu1 }
 0x133   :  { %1566 = vmatprep.mubr.bf16.mxu0 %v3950_v49  ;;  %v4890_v46 = vpop.f32.mrb[7].mxu1  ;;  %v3982_v49 = vld [vmem:[%s5795_s3 + $0x78] sm:$0xff]  }
 0x134   :  { %3286 = vmatprep.subr.bf16.mxu1 %v3982_v49 }
 0x138   :  { %v4898_v56 = vpop.f32.mrb[8].mxu1 }
 0x139   :  { %v4900_v59 = vpop.f32.mrb[9].mxu1 }
 0x13a   :  { %1567 = vmatmul.mubr.bf16.gmra.mrb[60].mxu0 %v3952_v50  ;;  %v4902_v60 = vpop.f32.mrb[10].mxu1  ;;  %v3983_v50 = vld [vmem:[%s5795_s3 + $0x38] sm:$0xff]  }
 0x13b   :  { %1609 = vmatprep.mubr.bf16.mxu0 %v3958_v55  ;;  %v4904_v61 = vpop.f32.mrb[11].mxu1  ;;  %3287 = vmatpush3.bf16.msra.mxu1 %v3983_v50 }
 0x140   :  { %v4909_v1 = vpop.f32.mrb[12].mxu1 }
 0x141   :  { %v4914_v3 = vpop.f32.mrb[13].mxu1 }
 0x142   :  { %1610 = vmatmul.mubr.bf16.vlgmr.msra.gmra.mrb[0].mxu0 %v3956_v32  ;;  %v4916_v5 = vpop.f32.mrb[14].mxu1 }
 0x143   :  { %1619 = vmatprep.mubr.bf16.mxu0 %v3959_v12  ;;  %v4918_v7 = vpop.f32.mrb[15].mxu1 }
 0x148   :  { %v4920_v8 = vpop.f32.mrb[16].mxu1 }
 0x149   :  { %v4922_v11 = vpop.f32.mrb[17].mxu1 }
 0x14a   :  { %1620 = vmatmul.mubr.bf16.gmra.mrb[4].mxu0 %v3961_v15  ;;  %v4924_v33 = vpop.f32.mrb[18].mxu1 }
 0x14b   :  { %1629 = vmatprep.mubr.bf16.mxu0 %v3962_v16  ;;  %v4926_v34 = vpop.f32.mrb[19].mxu1  ;;  %v221_v16 = vlaneseq }
 0x150   :  { %v4934_v43 = vpop.f32.mrb[20].mxu1 }
 0x151   :  { %v4936_v44 = vpop.f32.mrb[21].mxu1 }
 0x152   :  { %1630 = vmatmul.mubr.bf16.gmra.mrb[8].mxu0 %v3964_v21  ;;  %v4938_v47 = vpop.f32.mrb[22].mxu1 }
 0x153   :  { %1639 = vmatprep.mubr.bf16.mxu0 %v3965_v22  ;;  %v4940_v48 = vpop.f32.mrb[23].mxu1  ;;  %v222_v22 = vshrl.u32 %v221_v16, 7 }
 0x155   :  { %v223_v27 = vsub.s32 0, %v222_v22  ;;  %v227_v51 = vsub.s32 1, %v222_v22 }
 0x158   :  { %v4945_v54 = vpop.f32.mrb[24].mxu1 }
 0x159   :  { %v4950_v58 = vpop.f32.mrb[25].mxu1 }
 0x15a   :  { %1640 = vmatmul.mubr.bf16.gmra.mrb[12].mxu0 %v3967_v37  ;;  %v4952_v63 = vpop.f32.mrb[26].mxu1  ;;  %v219_v37 = vld [vmem:[%s5796_s2] sm:$0x3] }
 0x15b   :  { %v4954_v0 = vpop.f32.mrb[27].mxu1  ;;  %v5011_v52 = vrot.slane %v219_v37, %v223_v27  ;;  %v5013_v62 = vrot.slane %v219_v37, %v227_v51 }
 0x160   :  { %v4956_v4 = vpop.f32.mrb[28].mxu1 }
 0x161   :  { %v4958_v6 = vpop.f32.mrb[29].mxu1 }
 0x162   :  { %v4960_v9 = vpop.f32.mrb[30].mxu1 }
 0x163   :  { %v4962_v10 = vpop.f32.mrb[31].mxu1 }
 0x168   :  { %v4970_v19 = vpop.f32.mrb[32].mxu1 }
 0x169   :  { %v4972_v20 = vpop.f32.mrb[33].mxu1 }
 0x16a   :  { %v4974_v24 = vpop.f32.mrb[34].mxu1 }
 0x16b   :  { %v4976_v25 = vpop.f32.mrb[35].mxu1 }
 0x170   :  { %v4978_v30 = vpop.f32.mrb[36].mxu1 }
 0x171   :  { %v4980_v35 = vpop.f32.mrb[37].mxu1 }
 0x172   :  { %v4982_v38 = vpop.f32.mrb[38].mxu1 }
 0x173   :  { %v4984_v39 = vpop.f32.mrb[39].mxu1 }
 0x197   :  { %v4992_v55 = vpop.f32.mrb[40].mxu1 }
 0x198   :  { %v4994_v32 = vpop.f32.mrb[41].mxu1 }
 0x199   :  { %v4996_v12 = vpop.f32.mrb[42].mxu1 }
 0x19a   :  { %v4998_v15 = vpop.f32.mrb[43].mxu1 }
 0x19f   :  { %v5000_v17 = vpop.f32.mrb[44].mxu1 }
 0x1a0   :  { %v5002_v18 = vpop.f32.mrb[45].mxu1 }
 0x1a1   :  { %v5004_v21 = vpop.f32.mrb[46].mxu1 }
 0x1a2   :  { %5810 = vst [vmem:[#allocation2_spill] sm:$0xff] %v5004_v21  ;;  %v5006_v23 = vpop.f32.mrb[47].mxu1 }
 0x1a3   :  { %5811 = vst [vmem:[#allocation3_spill] sm:$0xff] %v5006_v23 }
 0x1b5   :  { %v1458_v2 = vpop.f32.mrb[16].mxu0 }
 0x1b6   :  { %v3504_v36 = vadd.f32 %v1458_v2, %v5011_v52  ;;  %v1460_v40 = vpop.f32.mrb[17].mxu0 }
 0x1b7   :  { %v3506_v53 = vadd.f32 %v1460_v40, %v5013_v62  ;;  %v1462_v57 = vpop.f32.mrb[18].mxu0 }
 0x1b8   :  { %v3508_v13 = vadd.f32 %v1462_v57, %v5011_v52  ;;  %v3505_v14 = vadd.f32 %v3504_v36, %v4870_v26  ;;  %v1464_v49 = vpop.f32.mrb[19].mxu0 }
 0x1b9   :  { %v3510_v50 = vadd.f32 %v1464_v49, %v5013_v62  ;;  %v3507_v16 = vadd.f32 %v3506_v53, %v4875_v28 }
 0x1ba   :  { %v1850_v22 = vmul.f32 0.01, %v3505_v14  ;;  %v3509_v27 = vadd.f32 %v3508_v13, %v4877_v29  ;;  %vm1786_vm0 = vcmp.ge.f32.partialorder %v3505_v14, 0.0 }
 0x1bb   :  { %v1851_v37 = vmul.f32 0.01, %v3507_v16  ;;  %v3511_v51 = vadd.f32 %v3510_v50, %v4879_v31  ;;  %vm1787_vm1 = vcmp.ge.f32.partialorder %v3507_v16, 0.0 }
 0x1bc   :  { %vm1788_vm2 = vcmp.ge.f32.partialorder %v3509_v27, 0.0  ;;  %v1852_v2 = vmul.f32 0.01, %v3509_v27  ;;  %v5024_v23 = vsel %vm1786_vm0, %v3505_v14, %v1850_v22 }
 0x1bd   :  { %vm1789_vm3 = vcmp.ge.f32.partialorder %v3511_v51, 0.0  ;;  %v1853_v40 = vmul.f32 0.01, %v3511_v51  ;;  %v1468_v57 = vpop.f32.mrb[20].mxu0  ;;  %v5029_v53 = vsel %vm1787_vm1, %v3507_v16, %v1851_v37 }
 0x1be   :  { %v3512_v26 = vadd.f32 %v1468_v57, %v5011_v52  ;;  %v1470_v36 = vpop.f32.mrb[21].mxu0  ;;  %v5026_v49 = vsel %vm1788_vm2, %v3509_v27, %v1852_v2 }
 0x1bf   :  { %v3514_v28 = vadd.f32 %v1470_v36, %v5013_v62  ;;  %v1472_v29 = vpop.f32.mrb[22].mxu0  ;;  %v5031_v13 = vsel %vm1789_vm3, %v3511_v51, %v1853_v40 }
 0x1c0   :  { %v3516_v50 = vadd.f32 %v1472_v29, %v5011_v52  ;;  %v3513_v21 = vadd.f32 %v3512_v26, %v4884_v41  ;;  %v1474_v57 = vpop.f32.mrb[23].mxu0 }
 0x1c1   :  { %v3518_v22 = vadd.f32 %v1474_v57, %v5013_v62  ;;  %v3515_v27 = vadd.f32 %v3514_v28, %v4886_v42 }
 0x1c2   :  { %v1854_v2 = vmul.f32 0.01, %v3513_v21  ;;  %v3517_v16 = vadd.f32 %v3516_v50, %v4888_v45  ;;  %vm1790_vm4 = vcmp.ge.f32.partialorder %v3513_v21, 0.0 }
 0x1c3   :  { %v1855_v37 = vmul.f32 0.01, %v3515_v27  ;;  %v3519_v51 = vadd.f32 %v3518_v22, %v4890_v46  ;;  %vm1791_vm5 = vcmp.ge.f32.partialorder %v3515_v27, 0.0 }
 0x1c4   :  { %vm1792_vm6 = vcmp.ge.f32.partialorder %v3517_v16, 0.0  ;;  %v1856_v40 = vmul.f32 0.01, %v3517_v16  ;;  %v5044_v31 = vsel %vm1790_vm4, %v3513_v21, %v1854_v2 }
 0x1c5   :  { %vm1793_vm7 = vcmp.ge.f32.partialorder %v3519_v51, 0.0  ;;  %v1857_v41 = vmul.f32 0.01, %v3519_v51  ;;  %v1478_v26 = vpop.f32.mrb[24].mxu0  ;;  %v5049_v28 = vsel %vm1791_vm5, %v3515_v27, %v1855_v37 }
 0x1c6   :  { %v3520_v36 = vadd.f32 %v1478_v26, %v5011_v52  ;;  %v1480_v29 = vpop.f32.mrb[25].mxu0  ;;  %v5046_v57 = vsel %vm1792_vm6, %v3517_v16, %v1856_v40 }
 0x1c7   :  { %v3522_v42 = vadd.f32 %v1480_v29, %v5013_v62  ;;  %v1482_v45 = vpop.f32.mrb[26].mxu0  ;;  %v5051_v50 = vsel %vm1793_vm7, %v3519_v51, %v1857_v41 }
 0x1c8   :  { %v3524_v22 = vadd.f32 %v1482_v45, %v5011_v52  ;;  %v3521_v14 = vadd.f32 %v3520_v36, %v4898_v56  ;;  %v1484_v26 = vpop.f32.mrb[27].mxu0 }
 0x1c9   :  { %v3526_v2 = vadd.f32 %v1484_v26, %v5013_v62  ;;  %v3523_v16 = vadd.f32 %v3522_v42, %v4900_v59 }
 0x1ca   :  { %v1858_v40 = vmul.f32 0.01, %v3521_v14  ;;  %v3525_v27 = vadd.f32 %v3524_v22, %v4902_v60  ;;  %vm1794_vm8 = vcmp.ge.f32.partialorder %v3521_v14, 0.0 }
 0x1cb   :  { %v1859_v37 = vmul.f32 0.01, %v3523_v16  ;;  %v3527_v51 = vadd.f32 %v3526_v2, %v4904_v61  ;;  %vm1795_vm9 = vcmp.ge.f32.partialorder %v3523_v16, 0.0 }
 0x1cc   :  { %vm1796_vm10 = vcmp.ge.f32.partialorder %v3525_v27, 0.0  ;;  %v1860_v41 = vmul.f32 0.01, %v3525_v27  ;;  %v5064_v46 = vsel %vm1794_vm8, %v3521_v14, %v1858_v40 }
 0x1cd   :  { %vm1797_vm11 = vcmp.ge.f32.partialorder %v3527_v51, 0.0  ;;  %v1861_v56 = vmul.f32 0.01, %v3527_v51  ;;  %v1488_v36 = vpop.f32.mrb[28].mxu0  ;;  %v5069_v42 = vsel %vm1795_vm9, %v3523_v16, %v1859_v37 }
 0x1ce   :  { %v3528_v29 = vadd.f32 %v1488_v36, %v5011_v52  ;;  %v1490_v45 = vpop.f32.mrb[29].mxu0  ;;  %v5066_v26 = vsel %vm1796_vm10, %v3525_v27, %v1860_v41 }
 0x1cf   :  { %v3530_v59 = vadd.f32 %v1490_v45, %v5013_v62  ;;  %v1492_v60 = vpop.f32.mrb[30].mxu0  ;;  %v5071_v22 = vsel %vm1797_vm11, %v3527_v51, %v1861_v56 }
 0x1d0   :  { %v3532_v2 = vadd.f32 %v1492_v60, %v5011_v52  ;;  %v3529_v21 = vadd.f32 %v3528_v29, %v4909_v1  ;;  %v1494_v36 = vpop.f32.mrb[31].mxu0 }
 0x1d1   :  { %v3534_v40 = vadd.f32 %v1494_v36, %v5013_v62  ;;  %v3531_v27 = vadd.f32 %v3530_v59, %v4914_v3 }
 0x1d2   :  { %v1862_v41 = vmul.f32 0.01, %v3529_v21  ;;  %v3533_v16 = vadd.f32 %v3532_v2, %v4916_v5  ;;  %vm1798_vm12 = vcmp.ge.f32.partialorder %v3529_v21, 0.0 }
 0x1d3   :  { %v1863_v37 = vmul.f32 0.01, %v3531_v27  ;;  %v3535_v51 = vadd.f32 %v3534_v40, %v4918_v7  ;;  %vm1799_vm13 = vcmp.ge.f32.partialorder %v3531_v27, 0.0 }
 0x1d4   :  { %vm1800_vm14 = vcmp.ge.f32.partialorder %v3533_v16, 0.0  ;;  %v1864_v56 = vmul.f32 0.01, %v3533_v16  ;;  %v5084_v61 = vsel %vm1798_vm12, %v3529_v21, %v1862_v41 }
 0x1d5   :  { %vm1801_vm15 = vcmp.ge.f32.partialorder %v3535_v51, 0.0  ;;  %v1865_v1 = vmul.f32 0.01, %v3535_v51  ;;  %v1498_v29 = vpop.f32.mrb[32].mxu0  ;;  %v5089_v59 = vsel %vm1799_vm13, %v3531_v27, %v1863_v37 }
 0x1d6   :  { %v3536_v45 = vadd.f32 %v1498_v29, %v5011_v52  ;;  %v1500_v60 = vpop.f32.mrb[33].mxu0  ;;  %v5086_v36 = vsel %vm1800_vm14, %v3533_v16, %v1864_v56 }
 0x1d7   :  { %v3538_v3 = vadd.f32 %v1500_v60, %v5013_v62  ;;  %v1502_v5 = vpop.f32.mrb[34].mxu0  ;;  %v5091_v2 = vsel %vm1801_vm15, %v3535_v51, %v1865_v1 }
 0x1d8   :  { %v3540_v40 = vadd.f32 %v1502_v5, %v5011_v52  ;;  %v3537_v14 = vadd.f32 %v3536_v45, %v4920_v8  ;;  %v1504_v29 = vpop.f32.mrb[35].mxu0 }
 0x1d9   :  { %v3542_v41 = vadd.f32 %v1504_v29, %v5013_v62  ;;  %v3539_v16 = vadd.f32 %v3538_v3, %v4922_v11 }
 0x1da   :  { %v1866_v56 = vmul.f32 0.01, %v3537_v14  ;;  %v3541_v27 = vadd.f32 %v3540_v40, %v4924_v33  ;;  %vm1802_vm0 = vcmp.ge.f32.partialorder %v3537_v14, 0.0 }
 0x1db   :  { %v1867_v37 = vmul.f32 0.01, %v3539_v16  ;;  %v3543_v51 = vadd.f32 %v3542_v41, %v4926_v34  ;;  %vm1803_vm1 = vcmp.ge.f32.partialorder %v3539_v16, 0.0 }
 0x1dc   :  { %vm1804_vm2 = vcmp.ge.f32.partialorder %v3541_v27, 0.0  ;;  %v1868_v1 = vmul.f32 0.01, %v3541_v27  ;;  %v5104_v7 = vsel %vm1802_vm0, %v3537_v14, %v1866_v56 }
 0x1dd   :  { %vm1805_vm3 = vcmp.ge.f32.partialorder %v3543_v51, 0.0  ;;  %v1869_v8 = vmul.f32 0.01, %v3543_v51  ;;  %v1508_v45 = vpop.f32.mrb[36].mxu0  ;;  %v5109_v3 = vsel %vm1803_vm1, %v3539_v16, %v1867_v37 }
 0x1de   :  { %v3544_v60 = vadd.f32 %v1508_v45, %v5011_v52  ;;  %v1510_v5 = vpop.f32.mrb[37].mxu0  ;;  %v5106_v29 = vsel %vm1804_vm2, %v3541_v27, %v1868_v1 }
 0x1df   :  { %v3546_v11 = vadd.f32 %v1510_v5, %v5013_v62  ;;  %v1512_v33 = vpop.f32.mrb[38].mxu0  ;;  %v5111_v40 = vsel %vm1805_vm3, %v3543_v51, %v1869_v8 }
 0x1e0   :  { %v3548_v41 = vadd.f32 %v1512_v33, %v5011_v52  ;;  %v3545_v21 = vadd.f32 %v3544_v60, %v4934_v43  ;;  %v1514_v45 = vpop.f32.mrb[39].mxu0 }
 0x1e1   :  { %v3550_v56 = vadd.f32 %v1514_v45, %v5013_v62  ;;  %v3547_v27 = vadd.f32 %v3546_v11, %v4936_v44 }
 0x1e2   :  { %v1870_v1 = vmul.f32 0.01, %v3545_v21  ;;  %v3549_v16 = vadd.f32 %v3548_v41, %v4938_v47  ;;  %vm1806_vm4 = vcmp.ge.f32.partialorder %v3545_v21, 0.0 }
 0x1e3   :  { %v1871_v37 = vmul.f32 0.01, %v3547_v27  ;;  %v3551_v51 = vadd.f32 %v3550_v56, %v4940_v48  ;;  %vm1807_vm5 = vcmp.ge.f32.partialorder %v3547_v27, 0.0 }
 0x1e4   :  { %vm1808_vm6 = vcmp.ge.f32.partialorder %v3549_v16, 0.0  ;;  %v1872_v8 = vmul.f32 0.01, %v3549_v16  ;;  %v5124_v34 = vsel %vm1806_vm4, %v3545_v21, %v1870_v1 }
 0x1e5   :  { %vm1809_vm7 = vcmp.ge.f32.partialorder %v3551_v51, 0.0  ;;  %v1873_v43 = vmul.f32 0.01, %v3551_v51  ;;  %v1518_v60 = vpop.f32.mrb[40].mxu0  ;;  %v5129_v11 = vsel %vm1807_vm5, %v3547_v27, %v1871_v37 }
 0x1e6   :  { %v3552_v5 = vadd.f32 %v1518_v60, %v5011_v52  ;;  %v1520_v33 = vpop.f32.mrb[41].mxu0  ;;  %v5126_v45 = vsel %vm1808_vm6, %v3549_v16, %v1872_v8 }
 0x1e7   :  { %v3554_v44 = vadd.f32 %v1520_v33, %v5013_v62  ;;  %v1522_v47 = vpop.f32.mrb[42].mxu0  ;;  %v5131_v41 = vsel %vm1809_vm7, %v3551_v51, %v1873_v43 }
 0x1e8   :  { %v3556_v56 = vadd.f32 %v1522_v47, %v5011_v52  ;;  %v3553_v14 = vadd.f32 %v3552_v5, %v4945_v54  ;;  %v1524_v60 = vpop.f32.mrb[43].mxu0 }
 0x1e9   :  { %v3558_v1 = vadd.f32 %v1524_v60, %v5013_v62  ;;  %v3555_v16 = vadd.f32 %v3554_v44, %v4950_v58 }
 0x1ea   :  { %v1874_v8 = vmul.f32 0.01, %v3553_v14  ;;  %v3557_v27 = vadd.f32 %v3556_v56, %v4952_v63  ;;  %vm1810_vm8 = vcmp.ge.f32.partialorder %v3553_v14, 0.0 }
 0x1eb   :  { %v1875_v37 = vmul.f32 0.01, %v3555_v16  ;;  %v3559_v51 = vadd.f32 %v3558_v1, %v4954_v0  ;;  %vm1811_vm9 = vcmp.ge.f32.partialorder %v3555_v16, 0.0 }
 0x1ec   :  { %vm1812_vm10 = vcmp.ge.f32.partialorder %v3557_v27, 0.0  ;;  %v1876_v43 = vmul.f32 0.01, %v3557_v27  ;;  %v5144_v48 = vsel %vm1810_vm8, %v3553_v14, %v1874_v8 }
 0x1ed   :  { %vm1813_vm11 = vcmp.ge.f32.partialorder %v3559_v51, 0.0  ;;  %v1877_v54 = vmul.f32 0.01, %v3559_v51  ;;  %v1528_v5 = vpop.f32.mrb[44].mxu0  ;;  %v5149_v44 = vsel %vm1811_vm9, %v3555_v16, %v1875_v37 }
 0x1ee   :  { %v3560_v33 = vadd.f32 %v1528_v5, %v5011_v52  ;;  %v1530_v47 = vpop.f32.mrb[45].mxu0  ;;  %v5146_v60 = vsel %vm1812_vm10, %v3557_v27, %v1876_v43 }
 0x1ef   :  { %v3562_v58 = vadd.f32 %v1530_v47, %v5013_v62  ;;  %v1532_v63 = vpop.f32.mrb[46].mxu0  ;;  %v5151_v56 = vsel %vm1813_vm11, %v3559_v51, %v1877_v54 }
 0x1f0   :  { %v3564_v1 = vadd.f32 %v1532_v63, %v5011_v52  ;;  %v3561_v21 = vadd.f32 %v3560_v33, %v4956_v4  ;;  %v1534_v5 = vpop.f32.mrb[47].mxu0 }
 0x1f1   :  { %v3566_v8 = vadd.f32 %v1534_v5, %v5013_v62  ;;  %v3563_v27 = vadd.f32 %v3562_v58, %v4958_v6 }
 0x1f2   :  { %v1878_v43 = vmul.f32 0.01, %v3561_v21  ;;  %v3565_v16 = vadd.f32 %v3564_v1, %v4960_v9  ;;  %vm1814_vm12 = vcmp.ge.f32.partialorder %v3561_v21, 0.0 }
 0x1f3   :  { %v1879_v37 = vmul.f32 0.01, %v3563_v27  ;;  %v3567_v51 = vadd.f32 %v3566_v8, %v4962_v10  ;;  %vm1815_vm13 = vcmp.ge.f32.partialorder %v3563_v27, 0.0 }
 0x1f4   :  { %vm1816_vm14 = vcmp.ge.f32.partialorder %v3565_v16, 0.0  ;;  %v1880_v54 = vmul.f32 0.01, %v3565_v16  ;;  %v5164_v0 = vsel %vm1814_vm12, %v3561_v21, %v1878_v43 }
 0x1f5   :  { %vm1817_vm15 = vcmp.ge.f32.partialorder %v3567_v51, 0.0  ;;  %v1881_v4 = vmul.f32 0.01, %v3567_v51  ;;  %v1538_v33 = vpop.f32.mrb[48].mxu0  ;;  %v5169_v58 = vsel %vm1815_vm13, %v3563_v27, %v1879_v37 }
 0x1f6   :  { %v3568_v47 = vadd.f32 %v1538_v33, %v5011_v52  ;;  %v1540_v63 = vpop.f32.mrb[49].mxu0  ;;  %v5166_v5 = vsel %vm1816_vm14, %v3565_v16, %v1880_v54 }
 0x1f7   :  { %v3570_v6 = vadd.f32 %v1540_v63, %v5013_v62  ;;  %v1542_v9 = vpop.f32.mrb[50].mxu0  ;;  %v5171_v1 = vsel %vm1817_vm15, %v3567_v51, %v1881_v4 }
 0x1f8   :  { %v3572_v8 = vadd.f32 %v1542_v9, %v5011_v52  ;;  %v3569_v14 = vadd.f32 %v3568_v47, %v4970_v19  ;;  %v1544_v33 = vpop.f32.mrb[51].mxu0 }
 0x1f9   :  { %v3574_v43 = vadd.f32 %v1544_v33, %v5013_v62  ;;  %v3571_v16 = vadd.f32 %v3570_v6, %v4972_v20 }
 0x1fa   :  { %v1882_v54 = vmul.f32 0.01, %v3569_v14  ;;  %v3573_v27 = vadd.f32 %v3572_v8, %v4974_v24  ;;  %vm1818_vm0 = vcmp.ge.f32.partialorder %v3569_v14, 0.0 }
 0x1fb   :  { %v1883_v37 = vmul.f32 0.01, %v3571_v16  ;;  %v3575_v51 = vadd.f32 %v3574_v43, %v4976_v25  ;;  %vm1819_vm1 = vcmp.ge.f32.partialorder %v3571_v16, 0.0 }
 0x1fc   :  { %vm1820_vm2 = vcmp.ge.f32.partialorder %v3573_v27, 0.0  ;;  %v1884_v4 = vmul.f32 0.01, %v3573_v27  ;;  %v5184_v10 = vsel %vm1818_vm0, %v3569_v14, %v1882_v54 }
 0x1fd   :  { %vm1821_vm3 = vcmp.ge.f32.partialorder %v3575_v51, 0.0  ;;  %v1885_v19 = vmul.f32 0.01, %v3575_v51  ;;  %v1548_v47 = vpop.f32.mrb[52].mxu0  ;;  %v5189_v6 = vsel %vm1819_vm1, %v3571_v16, %v1883_v37 }
 0x1fe   :  { %v3576_v63 = vadd.f32 %v1548_v47, %v5011_v52  ;;  %v1550_v9 = vpop.f32.mrb[53].mxu0  ;;  %v5186_v33 = vsel %vm1820_vm2, %v3573_v27, %v1884_v4 }
 0x1ff   :  { %v3578_v20 = vadd.f32 %v1550_v9, %v5013_v62  ;;  %v1552_v24 = vpop.f32.mrb[54].mxu0  ;;  %v5191_v8 = vsel %vm1821_vm3, %v3575_v51, %v1885_v19 }
 0x200   :  { %v3580_v43 = vadd.f32 %v1552_v24, %v5011_v52  ;;  %v3577_v21 = vadd.f32 %v3576_v63, %v4978_v30  ;;  %v1554_v47 = vpop.f32.mrb[55].mxu0 }
 0x201   :  { %v3582_v54 = vadd.f32 %v1554_v47, %v5013_v62  ;;  %v3579_v27 = vadd.f32 %v3578_v20, %v4980_v35 }
 0x202   :  { %v1886_v4 = vmul.f32 0.01, %v3577_v21  ;;  %v3581_v16 = vadd.f32 %v3580_v43, %v4982_v38  ;;  %vm1822_vm4 = vcmp.ge.f32.partialorder %v3577_v21, 0.0 }
 0x203   :  { %v1887_v37 = vmul.f32 0.01, %v3579_v27  ;;  %v3583_v51 = vadd.f32 %v3582_v54, %v4984_v39  ;;  %vm1823_vm5 = vcmp.ge.f32.partialorder %v3579_v27, 0.0 }
 0x204   :  { %vm1824_vm6 = vcmp.ge.f32.partialorder %v3581_v16, 0.0  ;;  %v1888_v19 = vmul.f32 0.01, %v3581_v16  ;;  %v5204_v25 = vsel %vm1822_vm4, %v3577_v21, %v1886_v4 }
 0x205   :  { %vm1825_vm7 = vcmp.ge.f32.partialorder %v3583_v51, 0.0  ;;  %v1889_v30 = vmul.f32 0.01, %v3583_v51  ;;  %v1558_v63 = vpop.f32.mrb[56].mxu0  ;;  %5812 = vst [vmem:[#allocation4_spill] sm:$0xff] %v5204_v25  ;;  %v5209_v20 = vsel %vm1823_vm5, %v3579_v27, %v1887_v37 }
 0x206   :  { %v3584_v9 = vadd.f32 %v1558_v63, %v5011_v52  ;;  %v1560_v24 = vpop.f32.mrb[57].mxu0  ;;  %v5206_v47 = vsel %vm1824_vm6, %v3581_v16, %v1888_v19 }
 0x207   :  { %v3586_v35 = vadd.f32 %v1560_v24, %v5013_v62  ;;  %v1562_v38 = vpop.f32.mrb[58].mxu0  ;;  %v5211_v43 = vsel %vm1825_vm7, %v3583_v51, %v1889_v30 }
 0x208   :  { %v3588_v54 = vadd.f32 %v1562_v38, %v5011_v52  ;;  %v3585_v14 = vadd.f32 %v3584_v9, %v4992_v55  ;;  %v1564_v63 = vpop.f32.mrb[59].mxu0 }
 0x209   :  { %v3590_v4 = vadd.f32 %v1564_v63, %v5013_v62  ;;  %v3587_v16 = vadd.f32 %v3586_v35, %v4994_v32 }
 0x20a   :  { %v1890_v19 = vmul.f32 0.01, %v3585_v14  ;;  %v3589_v27 = vadd.f32 %v3588_v54, %v4996_v12  ;;  %vm1826_vm8 = vcmp.ge.f32.partialorder %v3585_v14, 0.0 }
 0x20b   :  { %v1891_v37 = vmul.f32 0.01, %v3587_v16  ;;  %v3591_v51 = vadd.f32 %v3590_v4, %v4998_v15  ;;  %vm1827_vm9 = vcmp.ge.f32.partialorder %v3587_v16, 0.0 }
 0x20c   :  { %vm1828_vm10 = vcmp.ge.f32.partialorder %v3589_v27, 0.0  ;;  %v1892_v30 = vmul.f32 0.01, %v3589_v27  ;;  %v5224_v39 = vsel %vm1826_vm8, %v3585_v14, %v1890_v19 }
 0x20d   :  { %vm1829_vm11 = vcmp.ge.f32.partialorder %v3591_v51, 0.0  ;;  %v1893_v55 = vmul.f32 0.01, %v3591_v51  ;;  %v1568_v9 = vpop.f32.mrb[60].mxu0  ;;  %5813 = vst [vmem:[#allocation5_spill] sm:$0xff] %v5224_v39  ;;  %v5229_v35 = vsel %vm1827_vm9, %v3587_v16, %v1891_v37  ;;  %v5817_v16 = vld [vmem:[#allocation2_spill] sm:$0xff] }
 0x20e   :  { %v3592_v24 = vadd.f32 %v1568_v9, %v5011_v52  ;;  %v1570_v38 = vpop.f32.mrb[61].mxu0  ;;  %v5226_v63 = vsel %vm1828_vm10, %v3589_v27, %v1892_v30  ;;  %5815 = vst [vmem:[#allocation7_spill] sm:$0xff] %v5229_v35 }
 0x20f   :  { %5814 = vst [vmem:[#allocation6_spill] sm:$0xff] %v5226_v63  ;;  %v3594_v32 = vadd.f32 %v1570_v38, %v5013_v62  ;;  %v1572_v12 = vpop.f32.mrb[62].mxu0  ;;  %v5231_v54 = vsel %vm1829_vm11, %v3591_v51, %v1893_v55  ;;  %v5818_v55 = vld [vmem:[#allocation3_spill] sm:$0xff] }
 0x210   :  { %5816 = vst [vmem:[#allocation8_spill] sm:$0xff] %v5231_v54  ;;  %v3596_v4 = vadd.f32 %v1572_v12, %v5011_v52  ;;  %v3593_v21 = vadd.f32 %v3592_v24, %v5000_v17  ;;  %v1574_v9 = vpop.f32.mrb[63].mxu0 }
 0x211   :  { %v3598_v19 = vadd.f32 %v1574_v9, %v5013_v62  ;;  %v3595_v27 = vadd.f32 %v3594_v32, %v5002_v18 }
 0x212   :  { %v1894_v30 = vmul.f32 0.01, %v3593_v21  ;;  %v3597_v37 = vadd.f32 %v3596_v4, %v5817_v16  ;;  %vm1830_vm12 = vcmp.ge.f32.partialorder %v3593_v21, 0.0 }
 0x213   :  { %v1895_v51 = vmul.f32 0.01, %v3595_v27  ;;  %v3599_v38 = vadd.f32 %v3598_v19, %v5818_v55  ;;  %vm1831_vm13 = vcmp.ge.f32.partialorder %v3595_v27, 0.0 }
 0x214   :  { %vm1832_vm14 = vcmp.ge.f32.partialorder %v3597_v37, 0.0  ;;  %v1896_v12 = vmul.f32 0.01, %v3597_v37  ;;  %v5244_v39 = vsel %vm1830_vm12, %v3593_v21, %v1894_v30 }
 0x215   :  { %vm1833_vm15 = vcmp.ge.f32.partialorder %v3599_v38, 0.0  ;;  %v1897_v17 = vmul.f32 0.01, %v3599_v38  ;;  %v1611_v24 = vpop.f32.mrb[0].mxu0  ;;  %5819 = vst [vmem:[#allocation2_spill] sm:$0xff] %v5244_v39  ;;  %v5249_v4 = vsel %vm1831_vm13, %v3595_v27, %v1895_v51 }
 0x216   :  { %v3488_v15 = vadd.f32 %v1611_v24, %v5011_v52  ;;  %v1613_v14 = vpop.f32.mrb[1].mxu0  ;;  %v5246_v9 = vsel %vm1832_vm14, %v3597_v37, %v1896_v12  ;;  %5821 = vst [vmem:[#allocation9_spill] sm:$0xff] %v5249_v4  ;;  %v3984_v37 = vld [vmem:[%s5797_s5] sm:$0xff]  }
 0x217   :  { %5820 = vst [vmem:[#allocation3_spill] sm:$0xff] %v5246_v9  ;;  %v3489_v18 = vadd.f32 %v1613_v14, %v5013_v62  ;;  %v1615_v32 = vpop.f32.mrb[2].mxu0  ;;  %v5251_v16 = vsel %vm1833_vm15, %v3599_v38, %v1897_v17  ;;  %3408 = vmatprep.subr.bf16.mxu1 %v3984_v37 }
 0x218   :  { %5822 = vst [vmem:[#allocation10_spill] sm:$0xff] %v5251_v16  ;;  %v1834_v55 = vmul.f32 0.01, %v3488_v15  ;;  %v3490_v63 = vadd.f32 %v1615_v32, %v5011_v52  ;;  %v1617_v35 = vpop.f32.mrb[3].mxu0  ;;  %vm1770_vm0 = vcmp.ge.f32.partialorder %v3488_v15, 0.0  ;;  %v3985_v16 = vld [vmem:[%s5797_s5 + $0x8] sm:$0xff]  }
 0x219   :  { %vm1771_vm1 = vcmp.ge.f32.partialorder %v3489_v18, 0.0  ;;  %v1835_v30 = vmul.f32 0.01, %v3489_v18  ;;  %v3491_v14 = vadd.f32 %v1617_v35, %v5013_v62 }
 0x21a   :  { %vm1772_vm2 = vcmp.ge.f32.partialorder %v3490_v63, 0.0  ;;  %v1836_v27 = vmul.f32 0.01, %v3490_v63  ;;  %v1898_v38 = vsel %vm1770_vm0, %v3488_v15, %v1834_v55 }
 0x21b   :  { %vm1773_vm3 = vcmp.ge.f32.partialorder %v3491_v14, 0.0  ;;  %v1837_v51 = vmul.f32 0.01, %v3491_v14  ;;  %v1899_v32 = vsel %vm1771_vm1, %v3489_v18, %v1835_v30  ;;  %v3986_v30 = vld [vmem:[%s5797_s5 + $0x10] sm:$0xff]  }
 0x21c   :  { %v1900_v12 = vsel %vm1772_vm2, %v3490_v63, %v1836_v27 }
 0x21d   :  { %v1995_v17 = vpack.c.bf16 %v1900_v12, %v1898_v38  ;;  %v1621_v24 = vpop.f32.mrb[4].mxu0  ;;  %v1901_v19 = vsel %vm1773_vm3, %v3491_v14, %v1837_v51 }
 0x21e   :  { %v3492_v21 = vadd.f32 %v1621_v24, %v5011_v52  ;;  %v1623_v39 = vpop.f32.mrb[5].mxu0  ;;  %v1996_v9 = vpack.c.bf16 %v1901_v19, %v1899_v32 }
 0x21f   :  { %v3493_v35 = vadd.f32 %v1623_v39, %v5013_v62  ;;  %v1625_v4 = vpop.f32.mrb[6].mxu0 }
 0x220   :  { %v1838_v54 = vmul.f32 0.01, %v3492_v21  ;;  %v3494_v15 = vadd.f32 %v1625_v4, %v5011_v52  ;;  %v1627_v63 = vpop.f32.mrb[7].mxu0  ;;  %2161 = vmatprep.mubr.bf16.mxu1 %v1996_v9  ;;  %vm1774_vm4 = vcmp.ge.f32.partialorder %v3492_v21, 0.0 }
 0x221   :  { %v1839_v55 = vmul.f32 0.01, %v3493_v35  ;;  %v3495_v18 = vadd.f32 %v1627_v63, %v5013_v62  ;;  %2162 = vmatmul.mubr.bf16.vlgmr.msra.gmra.mrb[48].mxu1 %v1995_v17  ;;  %vm1775_vm5 = vcmp.ge.f32.partialorder %v3493_v35, 0.0  ;;  %v3987_v63 = vld [vmem:[%s5797_s5 + $0x18] sm:$0xff]  }
 0x222   :  { %vm1776_vm6 = vcmp.ge.f32.partialorder %v3494_v15, 0.0  ;;  %v1840_v19 = vmul.f32 0.01, %v3494_v15  ;;  %3409 = vmatpush3.bf16.msra.mxu1 %v3984_v37  ;;  %v1902_v14 = vsel %vm1774_vm4, %v3492_v21, %v1838_v54 }
 0x223   :  { %vm1777_vm7 = vcmp.ge.f32.partialorder %v3495_v18, 0.0  ;;  %v1841_v39 = vmul.f32 0.01, %v3495_v18  ;;  %3410 = vmatprep.subr.bf16.mxu1 %v3985_v16  ;;  %v1903_v9 = vsel %vm1775_vm5, %v3493_v35, %v1839_v55 }
 0x224   :  { %v1904_v4 = vsel %vm1776_vm6, %v3494_v15, %v1840_v19 }
 0x225   :  { %v1631_v27 = vpop.f32.mrb[8].mxu0  ;;  %v1905_v51 = vsel %vm1777_vm7, %v3495_v18, %v1841_v39  ;;  %v1997_v38 = vpack.c.bf16 %v1904_v4, %v1902_v14 }
 0x226   :  { %v3496_v12 = vadd.f32 %v1631_v27, %v5011_v52  ;;  %v1633_v17 = vpop.f32.mrb[9].mxu0  ;;  %v1998_v24 = vpack.c.bf16 %v1905_v51, %v1903_v9  ;;  %3411 = vmatpush3.bf16.msra.mxu1 %v3985_v16 }
 0x227   :  { %v3497_v37 = vadd.f32 %v1633_v17, %v5013_v62  ;;  %v1635_v32 = vpop.f32.mrb[10].mxu0  ;;  %3412 = vmatprep.subr.bf16.mxu1 %v3986_v30 }
 0x228   :  { %v1842_v25 = vmul.f32 0.01, %v3496_v12  ;;  %v3498_v54 = vadd.f32 %v1635_v32, %v5011_v52  ;;  %v1637_v21 = vpop.f32.mrb[11].mxu0  ;;  %2169 = vmatprep.mubr.bf16.mxu1 %v1998_v24  ;;  %vm1778_vm8 = vcmp.ge.f32.partialorder %v3496_v12, 0.0 }
 0x229   :  { %v1843_v35 = vmul.f32 0.01, %v3497_v37  ;;  %v3499_v15 = vadd.f32 %v1637_v21, %v5013_v62  ;;  %2170 = vmatmul.mubr.bf16.gmra.mrb[52].mxu1 %v1997_v38  ;;  %vm1779_vm9 = vcmp.ge.f32.partialorder %v3497_v37, 0.0 }
 0x22a   :  { %vm1780_vm10 = vcmp.ge.f32.partialorder %v3498_v54, 0.0  ;;  %v1844_v16 = vmul.f32 0.01, %v3498_v54  ;;  %3413 = vmatpush3.bf16.msra.mxu1 %v3986_v30  ;;  %v1906_v18 = vsel %vm1778_vm8, %v3496_v12, %v1842_v25 }
 0x22b   :  { %vm1781_vm11 = vcmp.ge.f32.partialorder %v3499_v15, 0.0  ;;  %v1845_v55 = vmul.f32 0.01, %v3499_v15  ;;  %3414 = vmatprep.subr.bf16.mxu1 %v3987_v63  ;;  %v1907_v14 = vsel %vm1779_vm9, %v3497_v37, %v1843_v35 }
 0x22c   :  { %v1908_v19 = vsel %vm1780_vm10, %v3498_v54, %v1844_v16 }
 0x22d   :  { %v1641_v39 = vpop.f32.mrb[12].mxu0  ;;  %v1909_v4 = vsel %vm1781_vm11, %v3499_v15, %v1845_v55  ;;  %v1999_v27 = vpack.c.bf16 %v1908_v19, %v1906_v18  ;;  %v5825_v19 = vpack.c.bf16 %v5051_v50, %v5049_v28  ;;  %v5834_v28 = vpack.c.bf16 %v5126_v45, %v5124_v34  ;;  %v5844_v34 = vld [vmem:[#allocation8_spill] sm:$0xff]  ;;  %v5845_v45 = vld [vmem:[#allocation7_spill] sm:$0xff] }
 0x22e   :  { %v3500_v9 = vadd.f32 %v1641_v39, %v5011_v52  ;;  %v1643_v51 = vpop.f32.mrb[13].mxu0  ;;  %v2000_v17 = vpack.c.bf16 %v1909_v4, %v1907_v14  ;;  %3415 = vmatpush3.bf16.msra.mxu1 %v3987_v63  ;;  %v5826_v39 = vpack.c.bf16 %v5046_v57, %v5044_v31  ;;  %v5827_v14 = vpack.c.bf16 %v5071_v22, %v5069_v42  ;;  %v3988_v42 = vld [vmem:[%s5797_s5 + $0x20] sm:$0xff]  }
 0x22f   :  { %v3501_v38 = vadd.f32 %v1643_v51, %v5013_v62  ;;  %v1645_v24 = vpop.f32.mrb[14].mxu0  ;;  %v5832_v31 = vpack.c.bf16 %v5106_v29, %v5104_v7  ;;  %v5833_v57 = vpack.c.bf16 %v5131_v41, %v5129_v11  ;;  %v5835_v50 = vpack.c.bf16 %v5151_v56, %v5149_v44  ;;  %3416 = vmatprep.subr.bf16.mxu1 %v3988_v42  ;;  %v3991_v29 = vld [vmem:[%s5797_s5 + $0x38] sm:$0xff]   ;;  %v5847_v41 = vld [vmem:[#allocation6_spill] sm:$0xff] }
 0x230   :  { %v1846_v32 = vmul.f32 0.01, %v3500_v9  ;;  %v3502_v30 = vadd.f32 %v1645_v24, %v5011_v52  ;;  %v1647_v21 = vpop.f32.mrb[15].mxu0  ;;  %2177 = vmatprep.mubr.bf16.mxu1 %v2000_v17  ;;  %vm1782_vm12 = vcmp.ge.f32.partialorder %v3500_v9, 0.0  ;;  %v5823_v52 = vpack.c.bf16 %v5031_v13, %v5029_v53  ;;  %v5850_v44 = vld [vmem:[#allocation10_spill] sm:$0xff]  ;;  %v5851_v56 = vld [vmem:[#allocation9_spill] sm:$0xff] }
 0x231   :  { %v1847_v25 = vmul.f32 0.01, %v3501_v38  ;;  %v3503_v12 = vadd.f32 %v1647_v21, %v5013_v62  ;;  %2178 = vmatmul.mubr.bf16.gmra.mrb[56].mxu1 %v1999_v27  ;;  %vm1783_vm13 = vcmp.ge.f32.partialorder %v3501_v38, 0.0  ;;  %v5824_v62 = vpack.c.bf16 %v5026_v49, %v5024_v23 }
 0x232   :  { %vm1784_vm14 = vcmp.ge.f32.partialorder %v3502_v30, 0.0  ;;  %v1848_v37 = vmul.f32 0.01, %v3502_v30  ;;  %v1910_v35 = vsel %vm1782_vm12, %v3500_v9, %v1846_v32  ;;  %v5828_v53 = vpack.c.bf16 %v5066_v26, %v5064_v46  ;;  %3417 = vmatpush3.bf16.msra.mxu1 %v3988_v42 }
 0x233   :  { %vm1785_vm15 = vcmp.ge.f32.partialorder %v3503_v12, 0.0  ;;  %v1849_v54 = vmul.f32 0.01, %v3503_v12  ;;  %v1911_v15 = vsel %vm1783_vm13, %v3501_v38, %v1847_v25  ;;  %v5829_v23 = vpack.c.bf16 %v5091_v2, %v5089_v59  ;;  %v3990_v59 = vld [vmem:[%s5797_s5 + $0x30] sm:$0xff]  }
 0x234   :  { %v1912_v63 = vsel %vm1784_vm14, %v3502_v30, %v1848_v37  ;;  %v5830_v49 = vpack.c.bf16 %v5086_v36, %v5084_v61  ;;  %v5831_v13 = vpack.c.bf16 %v5111_v40, %v5109_v3  ;;  %v5836_v46 = vpack.c.bf16 %v5146_v60, %v5144_v48  ;;  %v3989_v36 = vld [vmem:[%s5797_s5 + $0x28] sm:$0xff]   ;;  %v5842_v3 = vld [vmem:[#allocation4_spill] sm:$0xff]  ;;  %v5848_v48 = vld [vmem:[#allocation5_spill] sm:$0xff] }
 0x235   :  { %v1913_v16 = vsel %vm1785_vm15, %v3503_v12, %v1849_v54  ;;  %v2001_v55 = vpack.c.bf16 %v1912_v63, %v1910_v35  ;;  %v5837_v26 = vpack.c.bf16 %v5171_v1, %v5169_v58  ;;  %v5838_v22 = vpack.c.bf16 %v5166_v5, %v5164_v0  ;;  %3418 = vmatprep.subr.bf16.mxu1 %v3989_v36  ;;  %v5853_v5 = vld [vmem:[#allocation3_spill] sm:$0xff]  ;;  %v5854_v58 = vld [vmem:[#allocation2_spill] sm:$0xff] }
 0x236   :  { %v2002_v18 = vpack.c.bf16 %v1913_v16, %v1911_v15  ;;  %v5839_v61 = vpack.c.bf16 %v5191_v8, %v5189_v6  ;;  %3419 = vmatpush3.bf16.msra.mxu1 %v3989_v36  ;;  %v5840_v2 = vpack.c.bf16 %v5186_v33, %v5184_v10  ;;  %v5841_v7 = vpack.c.bf16 %v5211_v43, %v5209_v20  ;;  %v5370_v33 = vld [vmem:[%s5798_s4] ss:$0 sm:$0xff] }
 0x237   :  { %3420 = vmatprep.subr.bf16.mxu1 %v3990_v59  ;;  %v5843_v40 = vpack.c.bf16 %v5206_v47, %v5842_v3  ;;  %v5846_v11 = vpack.c.bf16 %v5844_v34, %v5845_v45  ;;  %v5849_v60 = vpack.c.bf16 %v5847_v41, %v5848_v48  ;;  %v5852_v0 = vpack.c.bf16 %v5850_v44, %v5851_v56 }
 0x238   :  { %2185 = vmatprep.mubr.bf16.mxu1 %v2002_v18  ;;  %v5855_v1 = vpack.c.bf16 %v5853_v5, %v5854_v58 }
 0x239   :  { %2186 = vmatmul.mubr.bf16.gmra.mrb[60].mxu1 %v2001_v55 }
 0x23a   :  { %2193 = vmatprep.mubr.bf16.mxu1 %v5823_v52  ;;  %3421 = vmatpush3.bf16.msra.mxu1 %v3990_v59 }
 0x23b   :  { %3422 = vmatprep.subr.bf16.mxu1 %v3991_v29 }
 0x23e   :  { %3423 = vmatpush3.bf16.msra.mxu1 %v3991_v29 }
 0x241   :  { %2194 = vmatmul.mubr.bf16.gmra.mrb[64].mxu1 %v5824_v62 }
 0x242   :  { %2201 = vmatprep.mubr.bf16.mxu1 %v5825_v19 }
 0x249   :  { %2202 = vmatmul.mubr.bf16.gmra.mrb[68].mxu1 %v5826_v39 }
 0x24a   :  { %2209 = vmatprep.mubr.bf16.mxu1 %v5827_v14 }
 0x251   :  { %2210 = vmatmul.mubr.bf16.gmra.mrb[72].mxu1 %v5828_v53 }
 0x252   :  { %2217 = vmatprep.mubr.bf16.mxu1 %v5829_v23 }
 0x259   :  { %2218 = vmatmul.mubr.bf16.gmra.mrb[76].mxu1 %v5830_v49 }
 0x25a   :  { %2225 = vmatprep.mubr.bf16.mxu1 %v5831_v13 }
 0x261   :  { %2226 = vmatmul.mubr.bf16.gmra.mrb[80].mxu1 %v5832_v31 }
 0x262   :  { %2233 = vmatprep.mubr.bf16.mxu1 %v5833_v57 }
 0x269   :  { %2234 = vmatmul.mubr.bf16.gmra.mrb[84].mxu1 %v5834_v28 }
 0x26a   :  { %2241 = vmatprep.mubr.bf16.mxu1 %v5835_v50 }
 0x271   :  { %2242 = vmatmul.mubr.bf16.gmra.mrb[88].mxu1 %v5836_v46 }
 0x272   :  { %2249 = vmatprep.mubr.bf16.mxu1 %v5837_v26 }
 0x279   :  { %2250 = vmatmul.mubr.bf16.gmra.mrb[92].mxu1 %v5838_v22 }
 0x27a   :  { %2257 = vmatprep.mubr.bf16.mxu1 %v5839_v61 }
 0x281   :  { %2258 = vmatmul.mubr.bf16.gmra.mrb[96].mxu1 %v5840_v2 }
 0x282   :  { %2265 = vmatprep.mubr.bf16.mxu1 %v5841_v7 }
 0x289   :  { %2266 = vmatmul.mubr.bf16.gmra.mrb[100].mxu1 %v5843_v40 }
 0x28a   :  { %2273 = vmatprep.mubr.bf16.mxu1 %v5846_v11 }
 0x291   :  { %2274 = vmatmul.mubr.bf16.gmra.mrb[104].mxu1 %v5849_v60 }
 0x292   :  { %2281 = vmatprep.mubr.bf16.mxu1 %v5852_v0 }
 0x299   :  { %2282 = vmatmul.mubr.bf16.gmra.mrb[108].mxu1 %v5855_v1 }
 0x2f4   :  { %v3288_v10 = vpop.f32.mrb[48].mxu1 }
 0x2f5   :  { %v3289_v6 = vpop.f32.mrb[49].mxu1 }
 0x2f6   :  { %v3290_v8 = vadd.f32 %v3289_v6, %v3288_v10  ;;  %v3291_v47 = vpop.f32.mrb[50].mxu1 }
 0x2f7   :  { %v3292_v20 = vpop.f32.mrb[51].mxu1 }
 0x2f8   :  { %v2164_v43 = vadd.f32 %v3290_v8, %v5370_v33  ;;  %v3293_v4 = vadd.f32 %v3292_v20, %v3291_v47 }
 0x2fa   :  { %v2322_v27 = vmul.f32 0.01, %v2164_v43  ;;  %v2167_v9 = vadd.f32 %v3293_v4, %v5370_v33  ;;  %vm2290_vm0 = vcmp.ge.f32.partialorder %v2164_v43, 0.0 }
 0x2fc   :  { %vm2291_vm1 = vcmp.ge.f32.partialorder %v2167_v9, 0.0  ;;  %v2323_v51 = vmul.f32 0.01, %v2167_v9  ;;  %v3294_v17 = vpop.f32.mrb[52].mxu1  ;;  %v2354_v30 = vsel %vm2290_vm0, %v2164_v43, %v2322_v27 }
 0x2fd   :  { %v3295_v38 = vpop.f32.mrb[53].mxu1 }
 0x2fe   :  { %v3296_v24 = vadd.f32 %v3295_v38, %v3294_v17  ;;  %v3297_v32 = vpop.f32.mrb[54].mxu1  ;;  %v2355_v21 = vsel %vm2291_vm1, %v2167_v9, %v2323_v51 }
 0x2ff   :  { %v3298_v25 = vpop.f32.mrb[55].mxu1  ;;  %v2403_v12 = vpack.c.bf16 %v2355_v21, %v2354_v30 }
 0x300   :  { %v2172_v37 = vadd.f32 %v3296_v24, %v5370_v33  ;;  %v3299_v54 = vadd.f32 %v3298_v25, %v3297_v32 }
 0x301   :  { %3424 = vmatprep.mubr.bf16.mxu1 %v2403_v12 }
 0x302   :  { %v2324_v35 = vmul.f32 0.01, %v2172_v37  ;;  %v2175_v63 = vadd.f32 %v3299_v54, %v5370_v33  ;;  %vm2292_vm2 = vcmp.ge.f32.partialorder %v2172_v37, 0.0 }
 0x304   :  { %vm2293_vm3 = vcmp.ge.f32.partialorder %v2175_v63, 0.0  ;;  %v2325_v15 = vmul.f32 0.01, %v2175_v63  ;;  %v3300_v16 = vpop.f32.mrb[56].mxu1  ;;  %v2356_v18 = vsel %vm2292_vm2, %v2172_v37, %v2324_v35 }
 0x305   :  { %v3301_v55 = vpop.f32.mrb[57].mxu1 }
 0x306   :  { %v2357_v52 = vsel %vm2293_vm3, %v2175_v63, %v2325_v15  ;;  %v3302_v62 = vadd.f32 %v3301_v55, %v3300_v16  ;;  %v3303_v19 = vpop.f32.mrb[58].mxu1 }
 0x307   :  { %v2404_v39 = vpack.c.bf16 %v2357_v52, %v2356_v18  ;;  %v3304_v14 = vpop.f32.mrb[59].mxu1 }
 0x308   :  { %v2180_v53 = vadd.f32 %v3302_v62, %v5370_v33  ;;  %v3305_v23 = vadd.f32 %v3304_v14, %v3303_v19 }
 0x309   :  { %3425 = vmatmul.mubr.bf16.vlgmr.msra.gmra.mrb[112].mxu1 %v2404_v39 }
 0x30a   :  { %v2326_v49 = vmul.f32 0.01, %v2180_v53  ;;  %v2183_v13 = vadd.f32 %v3305_v23, %v5370_v33  ;;  %vm2294_vm4 = vcmp.ge.f32.partialorder %v2180_v53, 0.0 }
 0x30c   :  { %vm2295_vm5 = vcmp.ge.f32.partialorder %v2183_v13, 0.0  ;;  %v2327_v31 = vmul.f32 0.01, %v2183_v13  ;;  %v3306_v57 = vpop.f32.mrb[60].mxu1  ;;  %v2358_v26 = vsel %vm2294_vm4, %v2180_v53, %v2326_v49 }
 0x30d   :  { %v3307_v28 = vpop.f32.mrb[61].mxu1 }
 0x30e   :  { %v3308_v50 = vadd.f32 %v3307_v28, %v3306_v57  ;;  %v3309_v46 = vpop.f32.mrb[62].mxu1  ;;  %v2359_v42 = vsel %vm2295_vm5, %v2183_v13, %v2327_v31 }
 0x30f   :  { %v3310_v22 = vpop.f32.mrb[63].mxu1  ;;  %v2405_v61 = vpack.c.bf16 %v2359_v42, %v2358_v26 }
 0x310   :  { %v2188_v36 = vadd.f32 %v3308_v50, %v5370_v33  ;;  %v3311_v59 = vadd.f32 %v3310_v22, %v3309_v46 }
 0x311   :  { %3428 = vmatprep.mubr.bf16.mxu1 %v2405_v61 }
 0x312   :  { %v2328_v2 = vmul.f32 0.01, %v2188_v36  ;;  %v2191_v7 = vadd.f32 %v3311_v59, %v5370_v33  ;;  %vm2296_vm6 = vcmp.ge.f32.partialorder %v2188_v36, 0.0 }
 0x314   :  { %vm2297_vm7 = vcmp.ge.f32.partialorder %v2191_v7, 0.0  ;;  %v2329_v29 = vmul.f32 0.01, %v2191_v7  ;;  %v3312_v3 = vpop.f32.mrb[64].mxu1  ;;  %v2360_v11 = vsel %vm2296_vm6, %v2188_v36, %v2328_v2 }
 0x315   :  { %v3313_v40 = vpop.f32.mrb[65].mxu1 }
 0x316   :  { %v3314_v34 = vadd.f32 %v3313_v40, %v3312_v3  ;;  %v3315_v45 = vpop.f32.mrb[66].mxu1  ;;  %v2361_v41 = vsel %vm2297_vm7, %v2191_v7, %v2329_v29 }
 0x317   :  { %v3316_v48 = vpop.f32.mrb[67].mxu1  ;;  %v2406_v60 = vpack.c.bf16 %v2361_v41, %v2360_v11 }
 0x318   :  { %v2196_v44 = vadd.f32 %v3314_v34, %v5370_v33  ;;  %v3317_v56 = vadd.f32 %v3316_v48, %v3315_v45 }
 0x319   :  { %3429 = vmatmul.mubr.bf16.gmra.mrb[116].mxu1 %v2406_v60 }
 0x31a   :  { %v2330_v0 = vmul.f32 0.01, %v2196_v44  ;;  %v2199_v5 = vadd.f32 %v3317_v56, %v5370_v33  ;;  %vm2298_vm8 = vcmp.ge.f32.partialorder %v2196_v44, 0.0 }
 0x31c   :  { %vm2299_vm9 = vcmp.ge.f32.partialorder %v2199_v5, 0.0  ;;  %v2331_v58 = vmul.f32 0.01, %v2199_v5  ;;  %v3318_v1 = vpop.f32.mrb[68].mxu1  ;;  %v2362_v47 = vsel %vm2298_vm8, %v2196_v44, %v2330_v0 }
 0x31d   :  { %v3319_v10 = vpop.f32.mrb[69].mxu1 }
 0x31e   :  { %v3320_v6 = vadd.f32 %v3319_v10, %v3318_v1  ;;  %v3321_v8 = vpop.f32.mrb[70].mxu1  ;;  %v2363_v20 = vsel %vm2299_vm9, %v2199_v5, %v2331_v58 }
 0x31f   :  { %v3322_v43 = vpop.f32.mrb[71].mxu1  ;;  %v2407_v4 = vpack.c.bf16 %v2363_v20, %v2362_v47 }
 0x320   :  { %v2204_v27 = vadd.f32 %v3320_v6, %v5370_v33  ;;  %v3323_v9 = vadd.f32 %v3322_v43, %v3321_v8 }
 0x321   :  { %3432 = vmatprep.mubr.bf16.mxu1 %v2407_v4 }
 0x322   :  { %v2332_v51 = vmul.f32 0.01, %v2204_v27  ;;  %v2207_v17 = vadd.f32 %v3323_v9, %v5370_v33  ;;  %vm2300_vm10 = vcmp.ge.f32.partialorder %v2204_v27, 0.0 }
 0x324   :  { %vm2301_vm11 = vcmp.ge.f32.partialorder %v2207_v17, 0.0  ;;  %v2333_v38 = vmul.f32 0.01, %v2207_v17  ;;  %v3324_v24 = vpop.f32.mrb[72].mxu1  ;;  %v2364_v25 = vsel %vm2300_vm10, %v2204_v27, %v2332_v51 }
 0x325   :  { %v3325_v32 = vpop.f32.mrb[73].mxu1 }
 0x326   :  { %v3326_v30 = vadd.f32 %v3325_v32, %v3324_v24  ;;  %v3327_v21 = vpop.f32.mrb[74].mxu1  ;;  %v2365_v12 = vsel %vm2301_vm11, %v2207_v17, %v2333_v38 }
 0x327   :  { %v3328_v37 = vpop.f32.mrb[75].mxu1  ;;  %v2408_v54 = vpack.c.bf16 %v2365_v12, %v2364_v25 }
 0x328   :  { %v2212_v35 = vadd.f32 %v3326_v30, %v5370_v33  ;;  %v3329_v63 = vadd.f32 %v3328_v37, %v3327_v21 }
 0x329   :  { %3433 = vmatmul.mubr.bf16.gmra.mrb[120].mxu1 %v2408_v54 }
 0x32a   :  { %v2334_v15 = vmul.f32 0.01, %v2212_v35  ;;  %v2215_v16 = vadd.f32 %v3329_v63, %v5370_v33  ;;  %vm2302_vm12 = vcmp.ge.f32.partialorder %v2212_v35, 0.0 }
 0x32c   :  { %vm2303_vm13 = vcmp.ge.f32.partialorder %v2215_v16, 0.0  ;;  %v2335_v55 = vmul.f32 0.01, %v2215_v16  ;;  %v3330_v18 = vpop.f32.mrb[76].mxu1  ;;  %v2366_v39 = vsel %vm2302_vm12, %v2212_v35, %v2334_v15 }
 0x32d   :  { %v3331_v52 = vpop.f32.mrb[77].mxu1 }
 0x32e   :  { %v3332_v62 = vadd.f32 %v3331_v52, %v3330_v18  ;;  %v3333_v19 = vpop.f32.mrb[78].mxu1  ;;  %v2367_v14 = vsel %vm2303_vm13, %v2215_v16, %v2335_v55 }
 0x32f   :  { %v3334_v53 = vpop.f32.mrb[79].mxu1  ;;  %v2409_v23 = vpack.c.bf16 %v2367_v14, %v2366_v39 }
 0x330   :  { %v2220_v49 = vadd.f32 %v3332_v62, %v5370_v33  ;;  %v3335_v13 = vadd.f32 %v3334_v53, %v3333_v19 }
 0x331   :  { %3436 = vmatprep.mubr.bf16.mxu1 %v2409_v23 }
 0x332   :  { %v2336_v31 = vmul.f32 0.01, %v2220_v49  ;;  %v2223_v57 = vadd.f32 %v3335_v13, %v5370_v33  ;;  %vm2304_vm14 = vcmp.ge.f32.partialorder %v2220_v49, 0.0 }
 0x334   :  { %vm2305_vm15 = vcmp.ge.f32.partialorder %v2223_v57, 0.0  ;;  %v2337_v28 = vmul.f32 0.01, %v2223_v57  ;;  %v3336_v50 = vpop.f32.mrb[80].mxu1  ;;  %v2368_v22 = vsel %vm2304_vm14, %v2220_v49, %v2336_v31 }
 0x335   :  { %v3337_v46 = vpop.f32.mrb[81].mxu1 }
 0x336   :  { %v3338_v26 = vadd.f32 %v3337_v46, %v3336_v50  ;;  %v3339_v42 = vpop.f32.mrb[82].mxu1  ;;  %v2369_v61 = vsel %vm2305_vm15, %v2223_v57, %v2337_v28 }
 0x337   :  { %v3340_v36 = vpop.f32.mrb[83].mxu1  ;;  %v2410_v59 = vpack.c.bf16 %v2369_v61, %v2368_v22 }
 0x338   :  { %v2228_v2 = vadd.f32 %v3338_v26, %v5370_v33  ;;  %v3341_v7 = vadd.f32 %v3340_v36, %v3339_v42 }
 0x339   :  { %3437 = vmatmul.mubr.bf16.gmra.mrb[124].mxu1 %v2410_v59 }
 0x33a   :  { %v2338_v29 = vmul.f32 0.01, %v2228_v2  ;;  %v2231_v3 = vadd.f32 %v3341_v7, %v5370_v33  ;;  %vm2306_vm0 = vcmp.ge.f32.partialorder %v2228_v2, 0.0 }
 0x33c   :  { %vm2307_vm1 = vcmp.ge.f32.partialorder %v2231_v3, 0.0  ;;  %v2339_v40 = vmul.f32 0.01, %v2231_v3  ;;  %v3342_v34 = vpop.f32.mrb[84].mxu1  ;;  %v2370_v48 = vsel %vm2306_vm0, %v2228_v2, %v2338_v29 }
 0x33d   :  { %v3343_v45 = vpop.f32.mrb[85].mxu1 }
 0x33e   :  { %v3344_v11 = vadd.f32 %v3343_v45, %v3342_v34  ;;  %v3345_v41 = vpop.f32.mrb[86].mxu1  ;;  %v2371_v60 = vsel %vm2307_vm1, %v2231_v3, %v2339_v40 }
 0x33f   :  { %v3346_v44 = vpop.f32.mrb[87].mxu1  ;;  %v2411_v56 = vpack.c.bf16 %v2371_v60, %v2370_v48 }
 0x340   :  { %v2236_v0 = vadd.f32 %v3344_v11, %v5370_v33  ;;  %v3347_v5 = vadd.f32 %v3346_v44, %v3345_v41 }
 0x341   :  { %3440 = vmatprep.mubr.bf16.mxu1 %v2411_v56 }
 0x342   :  { %v2340_v58 = vmul.f32 0.01, %v2236_v0  ;;  %v2239_v1 = vadd.f32 %v3347_v5, %v5370_v33  ;;  %vm2308_vm2 = vcmp.ge.f32.partialorder %v2236_v0, 0.0 }
 0x344   :  { %vm2309_vm3 = vcmp.ge.f32.partialorder %v2239_v1, 0.0  ;;  %v2341_v10 = vmul.f32 0.01, %v2239_v1  ;;  %v3348_v6 = vpop.f32.mrb[88].mxu1  ;;  %v2372_v43 = vsel %vm2308_vm2, %v2236_v0, %v2340_v58 }
 0x345   :  { %v3349_v8 = vpop.f32.mrb[89].mxu1 }
 0x346   :  { %v3350_v47 = vadd.f32 %v3349_v8, %v3348_v6  ;;  %v3351_v20 = vpop.f32.mrb[90].mxu1  ;;  %v2373_v4 = vsel %vm2309_vm3, %v2239_v1, %v2341_v10 }
 0x347   :  { %v3352_v27 = vpop.f32.mrb[91].mxu1  ;;  %v2412_v9 = vpack.c.bf16 %v2373_v4, %v2372_v43 }
 0x348   :  { %v2244_v51 = vadd.f32 %v3350_v47, %v5370_v33  ;;  %v3353_v17 = vadd.f32 %v3352_v27, %v3351_v20 }
 0x349   :  { %3441 = vmatmul.mubr.bf16.gmra.mrb[128].mxu1 %v2412_v9 }
 0x34a   :  { %v2342_v38 = vmul.f32 0.01, %v2244_v51  ;;  %v2247_v24 = vadd.f32 %v3353_v17, %v5370_v33  ;;  %vm2310_vm4 = vcmp.ge.f32.partialorder %v2244_v51, 0.0 }
 0x34c   :  { %vm2311_vm5 = vcmp.ge.f32.partialorder %v2247_v24, 0.0  ;;  %v2343_v32 = vmul.f32 0.01, %v2247_v24  ;;  %v3354_v30 = vpop.f32.mrb[92].mxu1  ;;  %v2374_v37 = vsel %vm2310_vm4, %v2244_v51, %v2342_v38 }
 0x34d   :  { %v3355_v21 = vpop.f32.mrb[93].mxu1 }
 0x34e   :  { %v3356_v25 = vadd.f32 %v3355_v21, %v3354_v30  ;;  %v3357_v12 = vpop.f32.mrb[94].mxu1  ;;  %v2375_v54 = vsel %vm2311_vm5, %v2247_v24, %v2343_v32 }
 0x34f   :  { %v3358_v35 = vpop.f32.mrb[95].mxu1  ;;  %v2413_v63 = vpack.c.bf16 %v2375_v54, %v2374_v37  ;;  %v5407_v54 = vld [vmem:[%s5799_s6] ss:$0 sm:$0xff] }
 0x350   :  { %v2252_v15 = vadd.f32 %v3356_v25, %v5370_v33  ;;  %v3359_v16 = vadd.f32 %v3358_v35, %v3357_v12 }
 0x351   :  { %3444 = vmatprep.mubr.bf16.mxu1 %v2413_v63 }
 0x352   :  { %v2344_v55 = vmul.f32 0.01, %v2252_v15  ;;  %v2255_v18 = vadd.f32 %v3359_v16, %v5370_v33  ;;  %vm2312_vm6 = vcmp.ge.f32.partialorder %v2252_v15, 0.0 }
 0x354   :  { %vm2313_vm7 = vcmp.ge.f32.partialorder %v2255_v18, 0.0  ;;  %v2345_v52 = vmul.f32 0.01, %v2255_v18  ;;  %v3360_v62 = vpop.f32.mrb[96].mxu1  ;;  %v2376_v53 = vsel %vm2312_vm6, %v2252_v15, %v2344_v55 }
 0x355   :  { %v3361_v19 = vpop.f32.mrb[97].mxu1 }
 0x356   :  { %v3362_v39 = vadd.f32 %v3361_v19, %v3360_v62  ;;  %v3363_v14 = vpop.f32.mrb[98].mxu1  ;;  %v2377_v23 = vsel %vm2313_vm7, %v2255_v18, %v2345_v52 }
 0x357   :  { %v3364_v49 = vpop.f32.mrb[99].mxu1  ;;  %v2414_v13 = vpack.c.bf16 %v2377_v23, %v2376_v53 }
 0x358   :  { %v2260_v31 = vadd.f32 %v3362_v39, %v5370_v33  ;;  %v3365_v57 = vadd.f32 %v3364_v49, %v3363_v14 }
 0x359   :  { %3445 = vmatmul.mubr.bf16.gmra.mrb[132].mxu1 %v2414_v13 }
 0x35a   :  { %v2346_v28 = vmul.f32 0.01, %v2260_v31  ;;  %v2263_v50 = vadd.f32 %v3365_v57, %v5370_v33  ;;  %vm2314_vm8 = vcmp.ge.f32.partialorder %v2260_v31, 0.0 }
 0x35c   :  { %vm2315_vm9 = vcmp.ge.f32.partialorder %v2263_v50, 0.0  ;;  %v2347_v46 = vmul.f32 0.01, %v2263_v50  ;;  %v3366_v26 = vpop.f32.mrb[100].mxu1  ;;  %v2378_v36 = vsel %vm2314_vm8, %v2260_v31, %v2346_v28 }
 0x35d   :  { %v3367_v42 = vpop.f32.mrb[101].mxu1 }
 0x35e   :  { %v3368_v22 = vadd.f32 %v3367_v42, %v3366_v26  ;;  %v3369_v61 = vpop.f32.mrb[102].mxu1  ;;  %v2379_v59 = vsel %vm2315_vm9, %v2263_v50, %v2347_v46 }
 0x35f   :  { %v3370_v2 = vpop.f32.mrb[103].mxu1  ;;  %v2415_v7 = vpack.c.bf16 %v2379_v59, %v2378_v36 }
 0x360   :  { %v2268_v29 = vadd.f32 %v3368_v22, %v5370_v33  ;;  %v3371_v3 = vadd.f32 %v3370_v2, %v3369_v61 }
 0x361   :  { %3448 = vmatprep.mubr.bf16.mxu1 %v2415_v7 }
 0x362   :  { %v2348_v40 = vmul.f32 0.01, %v2268_v29  ;;  %v2271_v34 = vadd.f32 %v3371_v3, %v5370_v33  ;;  %vm2316_vm10 = vcmp.ge.f32.partialorder %v2268_v29, 0.0 }
 0x364   :  { %vm2317_vm11 = vcmp.ge.f32.partialorder %v2271_v34, 0.0  ;;  %v2349_v45 = vmul.f32 0.01, %v2271_v34  ;;  %v3372_v11 = vpop.f32.mrb[104].mxu1  ;;  %v2380_v44 = vsel %vm2316_vm10, %v2268_v29, %v2348_v40 }
 0x365   :  { %v3373_v41 = vpop.f32.mrb[105].mxu1 }
 0x366   :  { %v3374_v48 = vadd.f32 %v3373_v41, %v3372_v11  ;;  %v3375_v60 = vpop.f32.mrb[106].mxu1  ;;  %v2381_v56 = vsel %vm2317_vm11, %v2271_v34, %v2349_v45 }
 0x367   :  { %v3376_v0 = vpop.f32.mrb[107].mxu1  ;;  %v2416_v5 = vpack.c.bf16 %v2381_v56, %v2380_v44 }
 0x368   :  { %v2276_v58 = vadd.f32 %v3374_v48, %v5370_v33  ;;  %v3377_v1 = vadd.f32 %v3376_v0, %v3375_v60 }
 0x369   :  { %3449 = vmatmul.mubr.bf16.gmra.mrb[136].mxu1 %v2416_v5 }
 0x36a   :  { %v2350_v10 = vmul.f32 0.01, %v2276_v58  ;;  %v2279_v6 = vadd.f32 %v3377_v1, %v5370_v33  ;;  %vm2318_vm12 = vcmp.ge.f32.partialorder %v2276_v58, 0.0 }
 0x36c   :  { %vm2319_vm13 = vcmp.ge.f32.partialorder %v2279_v6, 0.0  ;;  %v2351_v8 = vmul.f32 0.01, %v2279_v6  ;;  %v3378_v47 = vpop.f32.mrb[108].mxu1  ;;  %v2382_v27 = vsel %vm2318_vm12, %v2276_v58, %v2350_v10 }
 0x36d   :  { %v3379_v20 = vpop.f32.mrb[109].mxu1 }
 0x36e   :  { %v3380_v43 = vadd.f32 %v3379_v20, %v3378_v47  ;;  %v3381_v4 = vpop.f32.mrb[110].mxu1  ;;  %v2383_v9 = vsel %vm2319_vm13, %v2279_v6, %v2351_v8 }
 0x36f   :  { %v3382_v51 = vpop.f32.mrb[111].mxu1  ;;  %v2417_v17 = vpack.c.bf16 %v2383_v9, %v2382_v27 }
 0x370   :  { %v2284_v38 = vadd.f32 %v3380_v43, %v5370_v33  ;;  %v3383_v24 = vadd.f32 %v3382_v51, %v3381_v4 }
 0x371   :  { %3452 = vmatprep.mubr.bf16.mxu1 %v2417_v17 }
 0x372   :  { %v2352_v32 = vmul.f32 0.01, %v2284_v38  ;;  %v2287_v30 = vadd.f32 %v3383_v24, %v5370_v33  ;;  %vm2320_vm14 = vcmp.ge.f32.partialorder %v2284_v38, 0.0 }
 0x374   :  { %vm2321_vm15 = vcmp.ge.f32.partialorder %v2287_v30, 0.0  ;;  %v2353_v21 = vmul.f32 0.01, %v2287_v30  ;;  %v2384_v25 = vsel %vm2320_vm14, %v2284_v38, %v2352_v32 }
 0x376   :  { %v2385_v12 = vsel %vm2321_vm15, %v2287_v30, %v2353_v21 }
 0x377   :  { %v2418_v37 = vpack.c.bf16 %v2385_v12, %v2384_v25 }
 0x379   :  { %3453 = vmatmul.mubr.bf16.gmra.mrb[140].mxu1 %v2418_v37 }
 0x3dc   :  { %v3426_v35 = vpop.f32.mrb[112].mxu1 }
 0x3dd   :  { %v2516_v63 = vadd.f32 %v3426_v35, %v5407_v54  ;;  %v2507_v15 = vpop.f32.mrb[113].mxu1 }
 0x3de   :  { %v2508_v16 = vadd.f32 %v5407_v54, %v2507_v15  ;;  %v3427_v55 = vpop.f32.mrb[114].mxu1 }
 0x3df   :  { %v2519_v33 = vadd.f32 %v3427_v55, %v5407_v54  ;;  %v2510_v18 = vpop.f32.mrb[115].mxu1  ;;  %vm2636_vm0 = vcmp.ge.f32.partialorder %v2516_v63, 0.0  ;;  %v2668_v52 = vmul.f32 0.01, %v2516_v63 }
 0x3e0   :  { %v2511_v62 = vadd.f32 %v5407_v54, %v2510_v18  ;;  %vm2634_vm1 = vcmp.ge.f32.partialorder %v2508_v16, 0.0  ;;  %v2666_v19 = vmul.f32 0.01, %v2508_v16 }
 0x3e1   :  { %v5413_v39 = vsel %vm2636_vm0, %v2516_v63, %v2668_v52  ;;  %v2669_v14 = vmul.f32 0.01, %v2519_v33  ;;  %vm2637_vm2 = vcmp.ge.f32.partialorder %v2519_v33, 0.0 }
 0x3e2   :  { %2734 = vmax.xlane.f32.xlu1 %v5413_v39  ;;  %v5416_v53 = vsel %vm2634_vm1, %v2508_v16, %v2666_v19  ;;  %v2667_v23 = vmul.f32 0.01, %v2511_v62  ;;  %vm2635_vm3 = vcmp.ge.f32.partialorder %v2511_v62, 0.0 }
 0x3e3   :  { %2730 = vmax.xlane.f32.xlu0 %v5416_v53  ;;  %v5419_v49 = vsel %vm2637_vm2, %v2519_v33, %v2669_v14 }
 0x3e4   :  { %v5422_v13 = vsel %vm2635_vm3, %v2511_v62, %v2667_v23 }
 0x3e6   :  { %2736 = vmax.xlane.f32.xlu1 %v5419_v49 }
 0x3e7   :  { %2732 = vmax.xlane.f32.xlu0 %v5422_v13 }
 0x3ec   :  { %v3430_v31 = vpop.f32.mrb[116].mxu1 }
 0x3ed   :  { %v2532_v57 = vadd.f32 %v3430_v31, %v5407_v54  ;;  %v2523_v28 = vpop.f32.mrb[117].mxu1 }
 0x3ee   :  { %v2524_v50 = vadd.f32 %v5407_v54, %v2523_v28  ;;  %v3431_v46 = vpop.f32.mrb[118].mxu1 }
 0x3ef   :  { %v2535_v26 = vadd.f32 %v3431_v46, %v5407_v54  ;;  %v2526_v42 = vpop.f32.mrb[119].mxu1  ;;  %vm2640_vm4 = vcmp.ge.f32.partialorder %v2532_v57, 0.0  ;;  %v2672_v22 = vmul.f32 0.01, %v2532_v57 }
 0x3f0   :  { %v2527_v61 = vadd.f32 %v5407_v54, %v2526_v42  ;;  %v2670_v2 = vmul.f32 0.01, %v2524_v50  ;;  %vm2638_vm6 = vcmp.ge.f32.partialorder %v2524_v50, 0.0 }
 0x3f1   :  { %v5429_v36 = vsel %vm2640_vm4, %v2532_v57, %v2672_v22  ;;  %vm2641_vm5 = vcmp.ge.f32.partialorder %v2535_v26, 0.0  ;;  %v2673_v59 = vmul.f32 0.01, %v2535_v26 }
 0x3f2   :  { %2742 = vmax.xlane.f32.xlu0 %v5429_v36  ;;  %v2671_v29 = vmul.f32 0.01, %v2527_v61  ;;  %vm2639_vm7 = vcmp.ge.f32.partialorder %v2527_v61, 0.0  ;;  %v5435_v3 = vsel %vm2638_vm6, %v2524_v50, %v2670_v2 }
 0x3f3   :  { %v5432_v7 = vsel %vm2641_vm5, %v2535_v26, %v2673_v59 }
 0x3f4   :  { %2744 = vmax.xlane.f32.xlu1 %v5432_v7  ;;  %v5438_v40 = vsel %vm2639_vm7, %v2527_v61, %v2671_v29 }
 0x3f6   :  { %2738 = vmax.xlane.f32.xlu0 %v5435_v3 }
 0x3f8   :  { %2740 = vmax.xlane.f32.xlu1 %v5438_v40 }
 0x3fc   :  { %v3434_v34 = vpop.f32.mrb[120].mxu1 }
 0x3fd   :  { %v2548_v45 = vadd.f32 %v3434_v34, %v5407_v54  ;;  %v2539_v11 = vpop.f32.mrb[121].mxu1 }
 0x3fe   :  { %v2540_v41 = vadd.f32 %v5407_v54, %v2539_v11  ;;  %v3435_v48 = vpop.f32.mrb[122].mxu1 }
 0x3ff   :  { %v2551_v60 = vadd.f32 %v3435_v48, %v5407_v54  ;;  %v2542_v44 = vpop.f32.mrb[123].mxu1  ;;  %vm2644_vm8 = vcmp.ge.f32.partialorder %v2548_v45, 0.0  ;;  %v2676_v56 = vmul.f32 0.01, %v2548_v45 }
 0x400   :  { %v2543_v0 = vadd.f32 %v5407_v54, %v2542_v44  ;;  %v2674_v1 = vmul.f32 0.01, %v2540_v41  ;;  %vm2642_vm10 = vcmp.ge.f32.partialorder %v2540_v41, 0.0 }
 0x401   :  { %v5445_v5 = vsel %vm2644_vm8, %v2548_v45, %v2676_v56  ;;  %vm2645_vm9 = vcmp.ge.f32.partialorder %v2551_v60, 0.0  ;;  %v2677_v58 = vmul.f32 0.01, %v2551_v60 }
 0x402   :  { %2750 = vmax.xlane.f32.xlu0 %v5445_v5  ;;  %v2675_v6 = vmul.f32 0.01, %v2543_v0  ;;  %vm2643_vm11 = vcmp.ge.f32.partialorder %v2543_v0, 0.0  ;;  %v5451_v8 = vsel %vm2642_vm10, %v2540_v41, %v2674_v1 }
 0x403   :  { %v5448_v10 = vsel %vm2645_vm9, %v2551_v60, %v2677_v58 }
 0x404   :  { %2752 = vmax.xlane.f32.xlu1 %v5448_v10  ;;  %v5454_v47 = vsel %vm2643_vm11, %v2543_v0, %v2675_v6 }
 0x406   :  { %2746 = vmax.xlane.f32.xlu0 %v5451_v8 }
 0x408   :  { %2748 = vmax.xlane.f32.xlu1 %v5454_v47 }
 0x40c   :  { %v3438_v20 = vpop.f32.mrb[124].mxu1 }
 0x40d   :  { %v2564_v43 = vadd.f32 %v3438_v20, %v5407_v54  ;;  %v2555_v4 = vpop.f32.mrb[125].mxu1 }
 0x40e   :  { %v2556_v27 = vadd.f32 %v5407_v54, %v2555_v4  ;;  %v3439_v9 = vpop.f32.mrb[126].mxu1 }
 0x40f   :  { %v2567_v51 = vadd.f32 %v3439_v9, %v5407_v54  ;;  %v2558_v17 = vpop.f32.mrb[127].mxu1  ;;  %vm2648_vm12 = vcmp.ge.f32.partialorder %v2564_v43, 0.0  ;;  %v2680_v38 = vmul.f32 0.01, %v2564_v43 }
 0x410   :  { %v2559_v24 = vadd.f32 %v5407_v54, %v2558_v17  ;;  %v2678_v21 = vmul.f32 0.01, %v2556_v27  ;;  %vm2646_vm14 = vcmp.ge.f32.partialorder %v2556_v27, 0.0 }
 0x411   :  { %v5461_v32 = vsel %vm2648_vm12, %v2564_v43, %v2680_v38  ;;  %vm2649_vm13 = vcmp.ge.f32.partialorder %v2567_v51, 0.0  ;;  %v2681_v30 = vmul.f32 0.01, %v2567_v51 }
 0x412   :  { %2758 = vmax.xlane.f32.xlu0 %v5461_v32  ;;  %v2679_v12 = vmul.f32 0.01, %v2559_v24  ;;  %vm2647_vm15 = vcmp.ge.f32.partialorder %v2559_v24, 0.0  ;;  %v5467_v37 = vsel %vm2646_vm14, %v2556_v27, %v2678_v21 }
 0x413   :  { %v5464_v25 = vsel %vm2649_vm13, %v2567_v51, %v2681_v30 }
 0x414   :  { %2760 = vmax.xlane.f32.xlu1 %v5464_v25  ;;  %v5470_v35 = vsel %vm2647_vm15, %v2559_v24, %v2679_v12 }
 0x416   :  { %2754 = vmax.xlane.f32.xlu0 %v5467_v37 }
 0x418   :  { %2756 = vmax.xlane.f32.xlu1 %v5470_v35 }
 0x41c   :  { %v3442_v63 = vpop.f32.mrb[128].mxu1 }
 0x41d   :  { %v2580_v15 = vadd.f32 %v3442_v63, %v5407_v54  ;;  %v2571_v16 = vpop.f32.mrb[129].mxu1 }
 0x41e   :  { %v2572_v55 = vadd.f32 %v5407_v54, %v2571_v16  ;;  %v3443_v33 = vpop.f32.mrb[130].mxu1 }
 0x41f   :  { %v2583_v18 = vadd.f32 %v3443_v33, %v5407_v54  ;;  %v2574_v52 = vpop.f32.mrb[131].mxu1  ;;  %vm2652_vm0 = vcmp.ge.f32.partialorder %v2580_v15, 0.0  ;;  %v2684_v62 = vmul.f32 0.01, %v2580_v15 }
 0x420   :  { %v2575_v19 = vadd.f32 %v5407_v54, %v2574_v52  ;;  %v2682_v31 = vmul.f32 0.01, %v2572_v55  ;;  %vm2650_vm2 = vcmp.ge.f32.partialorder %v2572_v55, 0.0 }
 0x421   :  { %v5477_v14 = vsel %vm2652_vm0, %v2580_v15, %v2684_v62  ;;  %vm2653_vm1 = vcmp.ge.f32.partialorder %v2583_v18, 0.0  ;;  %v2685_v23 = vmul.f32 0.01, %v2583_v18 }
 0x422   :  { %2766 = vmax.xlane.f32.xlu0 %v5477_v14  ;;  %v2683_v28 = vmul.f32 0.01, %v2575_v19  ;;  %vm2651_vm3 = vcmp.ge.f32.partialorder %v2575_v19, 0.0  ;;  %v5483_v50 = vsel %vm2650_vm2, %v2572_v55, %v2682_v31 }
 0x423   :  { %v5480_v57 = vsel %vm2653_vm1, %v2583_v18, %v2685_v23 }
 0x424   :  { %2768 = vmax.xlane.f32.xlu1 %v5480_v57  ;;  %v5486_v46 = vsel %vm2651_vm3, %v2575_v19, %v2683_v28 }
 0x426   :  { %2762 = vmax.xlane.f32.xlu0 %v5483_v50 }
 0x428   :  { %2764 = vmax.xlane.f32.xlu1 %v5486_v46 }
 0x42c   :  { %v3446_v26 = vpop.f32.mrb[132].mxu1 }
 0x42d   :  { %v2596_v42 = vadd.f32 %v3446_v26, %v5407_v54  ;;  %v2587_v22 = vpop.f32.mrb[133].mxu1 }
 0x42e   :  { %v2588_v61 = vadd.f32 %v5407_v54, %v2587_v22  ;;  %v3447_v59 = vpop.f32.mrb[134].mxu1 }
 0x42f   :  { %v2599_v2 = vadd.f32 %v3447_v59, %v5407_v54  ;;  %v2590_v29 = vpop.f32.mrb[135].mxu1  ;;  %vm2656_vm4 = vcmp.ge.f32.partialorder %v2596_v42, 0.0  ;;  %v2688_v34 = vmul.f32 0.01, %v2596_v42 }
 0x430   :  { %v2591_v45 = vadd.f32 %v5407_v54, %v2590_v29  ;;  %v2686_v48 = vmul.f32 0.01, %v2588_v61  ;;  %vm2654_vm6 = vcmp.ge.f32.partialorder %v2588_v61, 0.0 }
 0x431   :  { %v5493_v11 = vsel %vm2656_vm4, %v2596_v42, %v2688_v34  ;;  %vm2657_vm5 = vcmp.ge.f32.partialorder %v2599_v2, 0.0  ;;  %v2689_v41 = vmul.f32 0.01, %v2599_v2 }
 0x432   :  { %2774 = vmax.xlane.f32.xlu0 %v5493_v11  ;;  %v2687_v44 = vmul.f32 0.01, %v2591_v45  ;;  %vm2655_vm7 = vcmp.ge.f32.partialorder %v2591_v45, 0.0  ;;  %v5499_v56 = vsel %vm2654_vm6, %v2588_v61, %v2686_v48 }
 0x433   :  { %v5496_v60 = vsel %vm2657_vm5, %v2599_v2, %v2689_v41 }
 0x434   :  { %2776 = vmax.xlane.f32.xlu1 %v5496_v60  ;;  %v5502_v0 = vsel %vm2655_vm7, %v2591_v45, %v2687_v44 }
 0x436   :  { %2770 = vmax.xlane.f32.xlu0 %v5499_v56 }
 0x438   :  { %2772 = vmax.xlane.f32.xlu1 %v5502_v0 }
 0x43c   :  { %v3450_v58 = vpop.f32.mrb[136].mxu1 }
 0x43d   :  { %v2612_v1 = vadd.f32 %v3450_v58, %v5407_v54  ;;  %v2603_v6 = vpop.f32.mrb[137].mxu1 }
 0x43e   :  { %v2604_v20 = vadd.f32 %v5407_v54, %v2603_v6  ;;  %v3451_v43 = vpop.f32.mrb[138].mxu1 }
 0x43f   :  { %v2615_v4 = vadd.f32 %v3451_v43, %v5407_v54  ;;  %v2606_v27 = vpop.f32.mrb[139].mxu1  ;;  %vm2660_vm8 = vcmp.ge.f32.partialorder %v2612_v1, 0.0  ;;  %v2692_v9 = vmul.f32 0.01, %v2612_v1 }
 0x440   :  { %v2607_v51 = vadd.f32 %v5407_v54, %v2606_v27  ;;  %v2690_v24 = vmul.f32 0.01, %v2604_v20  ;;  %vm2658_vm10 = vcmp.ge.f32.partialorder %v2604_v20, 0.0 }
 0x441   :  { %v5509_v17 = vsel %vm2660_vm8, %v2612_v1, %v2692_v9  ;;  %vm2661_vm9 = vcmp.ge.f32.partialorder %v2615_v4, 0.0  ;;  %v2693_v38 = vmul.f32 0.01, %v2615_v4 }
 0x442   :  { %2782 = vmax.xlane.f32.xlu0 %v5509_v17  ;;  %v2691_v21 = vmul.f32 0.01, %v2607_v51  ;;  %vm2659_vm11 = vcmp.ge.f32.partialorder %v2607_v51, 0.0  ;;  %v5515_v12 = vsel %vm2658_vm10, %v2604_v20, %v2690_v24 }
 0x443   :  { %v5512_v30 = vsel %vm2661_vm9, %v2615_v4, %v2693_v38 }
 0x444   :  { %2784 = vmax.xlane.f32.xlu1 %v5512_v30  ;;  %v5518_v63 = vsel %vm2659_vm11, %v2607_v51, %v2691_v21 }
 0x446   :  { %2778 = vmax.xlane.f32.xlu0 %v5515_v12 }
 0x448   :  { %2780 = vmax.xlane.f32.xlu1 %v5518_v63 }
 0x44c   :  { %v3454_v15 = vpop.f32.mrb[140].mxu1 }
 0x44d   :  { %v2619_v16 = vpop.f32.mrb[141].mxu1  ;;  %v2628_v55 = vadd.f32 %v3454_v15, %v5407_v54 }
 0x44e   :  { %v2620_v33 = vadd.f32 %v5407_v54, %v2619_v16  ;;  %v3455_v18 = vpop.f32.mrb[142].mxu1 }
 0x44f   :  { %v2622_v52 = vpop.f32.mrb[143].mxu1  ;;  %v2631_v62 = vadd.f32 %v3455_v18, %v5407_v54  ;;  %v2696_v26 = vmul.f32 0.01, %v2628_v55  ;;  %vm2664_vm14 = vcmp.ge.f32.partialorder %v2628_v55, 0.0 }
 0x450   :  { %v2623_v19 = vadd.f32 %v5407_v54, %v2622_v52  ;;  %vm2662_vm12 = vcmp.ge.f32.partialorder %v2620_v33, 0.0  ;;  %v2694_v23 = vmul.f32 0.01, %v2620_v33 }
 0x451   :  { %v2697_v22 = vmul.f32 0.01, %v2631_v62  ;;  %vm2665_vm15 = vcmp.ge.f32.partialorder %v2631_v62, 0.0  ;;  %v5531_v61 = vsel %vm2664_vm14, %v2628_v55, %v2696_v26 }
 0x452   :  { %v5525_v31 = vsel %vm2662_vm12, %v2620_v33, %v2694_v23  ;;  %vm2663_vm13 = vcmp.ge.f32.partialorder %v2623_v19, 0.0  ;;  %v2695_v28 = vmul.f32 0.01, %v2623_v19 }
 0x453   :  { %2786 = vmax.xlane.f32.xlu0 %v5525_v31  ;;  %v5534_v54 = vsel %vm2665_vm15, %v2631_v62, %v2697_v22 }
 0x454   :  { %v5528_v42 = vsel %vm2663_vm13, %v2623_v19, %v2695_v28 }
 0x455   :  { %2788 = vmax.xlane.f32.xlu1 %v5528_v42 }
 0x457   :  { %2790 = vmax.xlane.f32.xlu0 %v5531_v61 }
 0x459   :  { %2792 = vmax.xlane.f32.xlu1 %v5534_v54 }
 0x46f   :  { %v2735_v59 = vpop.xlane.xlu1 %2734 }
 0x470   :  { %v2796_v2 = vsub.f32 %v5413_v39, %v2735_v59  ;;  %v2731_v29 = vpop.xlane.xlu0 %2730 }
 0x471   :  { %v2794_v34 = vsub.f32 %v5416_v53, %v2731_v29 }
 0x472   :  { %v2830_v45 = vmul.f32 1.442695, %v2796_v2 }
 0x473   :  { %v2826_v41 = vmul.f32 1.442695, %v2794_v34  ;;  %v2737_v48 = vpop.xlane.xlu1 %2736 }
 0x474   :  { %3992 = vpow2.f32 %v2830_v45  ;;  %v2797_v44 = vsub.f32 %v5419_v49, %v2737_v48  ;;  %v2733_v58 = vpop.xlane.xlu0 %2732 }
 0x475   :  { %v2795_v1 = vsub.f32 %v5422_v13, %v2733_v58  ;;  %3994 = vpow2.f32 %v2826_v41 }
 0x476   :  { %v2832_v6 = vmul.f32 1.442695, %v2797_v44 }
 0x477   :  { %v2828_v20 = vmul.f32 1.442695, %v2795_v1 }
 0x478   :  { %3996 = vpow2.f32 %v2832_v6 }
 0x479   :  { %3998 = vpow2.f32 %v2828_v20 }
 0x47e   :  { %v5541_v43 = vpop.eup %3992 }
 0x47f   :  { %2894 = vadd.xlane.f32.xlu0 %v5541_v43  ;;  %v2743_v39 = vpop.xlane.xlu0 %2742  ;;  %v5545_v4 = vpop.eup %3994 }
 0x480   :  { %v2800_v53 = vsub.f32 %v5429_v36, %v2743_v39 }
 0x481   :  { %v2745_v27 = vpop.xlane.xlu1 %2744 }
 0x482   :  { %v5547_v9 = vpop.eup %3996  ;;  %v2838_v49 = vmul.f32 1.442695, %v2800_v53  ;;  %v2801_v13 = vsub.f32 %v5432_v7, %v2745_v27 }
 0x483   :  { %2896 = vadd.xlane.f32.xlu1 %v5547_v9  ;;  %2890 = vadd.xlane.f32.xlu0 %v5545_v4  ;;  %v2739_v51 = vpop.xlane.xlu0 %2738  ;;  %v5553_v15 = vpop.eup %3998 }
 0x484   :  { %4000 = vpow2.f32 %v2838_v49  ;;  %v2840_v38 = vmul.f32 1.442695, %v2801_v13  ;;  %v2798_v24 = vsub.f32 %v5435_v3, %v2739_v51 }
 0x485   :  { %v2741_v21 = vpop.xlane.xlu1 %2740 }
 0x486   :  { %4002 = vpow2.f32 %v2840_v38  ;;  %v2834_v36 = vmul.f32 1.442695, %v2798_v24  ;;  %v2799_v16 = vsub.f32 %v5438_v40, %v2741_v21 }
 0x487   :  { %2892 = vadd.xlane.f32.xlu1 %v5553_v15 }
 0x488   :  { %4004 = vpow2.f32 %v2834_v36  ;;  %v2836_v7 = vmul.f32 1.442695, %v2799_v16 }
 0x48a   :  { %4006 = vpow2.f32 %v2836_v7 }
 0x48e   :  { %v5557_v55 = vpop.eup %4000 }
 0x48f   :  { %2902 = vadd.xlane.f32.xlu0 %v5557_v55  ;;  %v2751_v33 = vpop.xlane.xlu0 %2750 }
 0x490   :  { %v5560_v18 = vpop.eup %4002  ;;  %v2804_v3 = vsub.f32 %v5445_v5, %v2751_v33 }
 0x491   :  { %v2753_v52 = vpop.xlane.xlu1 %2752  ;;  %2904 = vadd.xlane.f32.xlu1 %v5560_v18 }
 0x492   :  { %v5564_v62 = vpop.eup %4004  ;;  %v2846_v40 = vmul.f32 1.442695, %v2804_v3  ;;  %v2805_v19 = vsub.f32 %v5448_v10, %v2753_v52 }
 0x493   :  { %2898 = vadd.xlane.f32.xlu0 %v5564_v62  ;;  %v2747_v23 = vpop.xlane.xlu0 %2746 }
 0x494   :  { %v5568_v28 = vpop.eup %4006  ;;  %4008 = vpow2.f32 %v2846_v40  ;;  %v2848_v26 = vmul.f32 1.442695, %v2805_v19  ;;  %v2802_v22 = vsub.f32 %v5451_v8, %v2747_v23 }
 0x495   :  { %v2749_v59 = vpop.xlane.xlu1 %2748  ;;  %2900 = vadd.xlane.f32.xlu1 %v5568_v28 }
 0x496   :  { %4010 = vpow2.f32 %v2848_v26  ;;  %v2842_v5 = vmul.f32 1.442695, %v2802_v22  ;;  %v2803_v2 = vsub.f32 %v5454_v47, %v2749_v59 }
 0x498   :  { %4012 = vpow2.f32 %v2842_v5  ;;  %v2844_v29 = vmul.f32 1.442695, %v2803_v2 }
 0x49a   :  { %4014 = vpow2.f32 %v2844_v29 }
 0x49e   :  { %v5573_v10 = vpop.eup %4008 }
 0x49f   :  { %2910 = vadd.xlane.f32.xlu0 %v5573_v10  ;;  %v2759_v34 = vpop.xlane.xlu0 %2758 }
 0x4a0   :  { %v5576_v45 = vpop.eup %4010  ;;  %v2808_v41 = vsub.f32 %v5461_v32, %v2759_v34 }
 0x4a1   :  { %v2761_v8 = vpop.xlane.xlu1 %2760  ;;  %2912 = vadd.xlane.f32.xlu1 %v5576_v45 }
 0x4a2   :  { %v5580_v48 = vpop.eup %4012  ;;  %v2854_v44 = vmul.f32 1.442695, %v2808_v41  ;;  %v2809_v47 = vsub.f32 %v5464_v25, %v2761_v8 }
 0x4a3   :  { %2906 = vadd.xlane.f32.xlu0 %v5580_v48  ;;  %v2755_v58 = vpop.xlane.xlu0 %2754 }
 0x4a4   :  { %v5584_v1 = vpop.eup %4014  ;;  %4016 = vpow2.f32 %v2854_v44  ;;  %v2856_v6 = vmul.f32 1.442695, %v2809_v47  ;;  %v2806_v20 = vsub.f32 %v5467_v37, %v2755_v58 }
 0x4a5   :  { %v2757_v39 = vpop.xlane.xlu1 %2756  ;;  %2908 = vadd.xlane.f32.xlu1 %v5584_v1 }
 0x4a6   :  { %4018 = vpow2.f32 %v2856_v6  ;;  %v2850_v32 = vmul.f32 1.442695, %v2806_v20  ;;  %v2807_v53 = vsub.f32 %v5470_v35, %v2757_v39 }
 0x4a8   :  { %4020 = vpow2.f32 %v2850_v32  ;;  %v2852_v27 = vmul.f32 1.442695, %v2807_v53 }
 0x4aa   :  { %4022 = vpow2.f32 %v2852_v27 }
 0x4ae   :  { %v5589_v25 = vpop.eup %4016 }
 0x4af   :  { %2918 = vadd.xlane.f32.xlu0 %v5589_v25  ;;  %v2767_v49 = vpop.xlane.xlu0 %2766 }
 0x4b0   :  { %v5592_v13 = vpop.eup %4018  ;;  %v2812_v51 = vsub.f32 %v5477_v14, %v2767_v49 }
 0x4b1   :  { %v2769_v37 = vpop.xlane.xlu1 %2768  ;;  %2920 = vadd.xlane.f32.xlu1 %v5592_v13 }
 0x4b2   :  { %v5596_v38 = vpop.eup %4020  ;;  %v2862_v24 = vmul.f32 1.442695, %v2812_v51  ;;  %v2813_v35 = vsub.f32 %v5480_v57, %v2769_v37 }
 0x4b3   :  { %2914 = vadd.xlane.f32.xlu0 %v5596_v38  ;;  %v2763_v21 = vpop.xlane.xlu0 %2762 }
 0x4b4   :  { %v5600_v36 = vpop.eup %4022  ;;  %4024 = vpow2.f32 %v2862_v24  ;;  %v2864_v16 = vmul.f32 1.442695, %v2813_v35  ;;  %v2810_v7 = vsub.f32 %v5483_v50, %v2763_v21 }
 0x4b5   :  { %v2765_v33 = vpop.xlane.xlu1 %2764  ;;  %2916 = vadd.xlane.f32.xlu1 %v5600_v36 }
 0x4b6   :  { %4026 = vpow2.f32 %v2864_v16  ;;  %v2858_v14 = vmul.f32 1.442695, %v2810_v7  ;;  %v2811_v3 = vsub.f32 %v5486_v46, %v2765_v33 }
 0x4b8   :  { %4028 = vpow2.f32 %v2858_v14  ;;  %v2860_v52 = vmul.f32 1.442695, %v2811_v3 }
 0x4ba   :  { %4030 = vpow2.f32 %v2860_v52 }
 0x4be   :  { %v5605_v57 = vpop.eup %4024 }
 0x4bf   :  { %2926 = vadd.xlane.f32.xlu0 %v5605_v57  ;;  %v2775_v40 = vpop.xlane.xlu0 %2774 }
 0x4c0   :  { %v5608_v19 = vpop.eup %4026  ;;  %v2816_v23 = vsub.f32 %v5493_v11, %v2775_v40 }
 0x4c1   :  { %v2777_v50 = vpop.xlane.xlu1 %2776  ;;  %2928 = vadd.xlane.f32.xlu1 %v5608_v19 }
 0x4c2   :  { %v5612_v26 = vpop.eup %4028  ;;  %v2870_v22 = vmul.f32 1.442695, %v2816_v23  ;;  %v2817_v46 = vsub.f32 %v5496_v60, %v2777_v50 }
 0x4c3   :  { %2922 = vadd.xlane.f32.xlu0 %v5612_v26  ;;  %v2771_v59 = vpop.xlane.xlu0 %2770 }
 0x4c4   :  { %v5616_v5 = vpop.eup %4030  ;;  %4032 = vpow2.f32 %v2870_v22  ;;  %v2872_v2 = vmul.f32 1.442695, %v2817_v46  ;;  %v2814_v29 = vsub.f32 %v5499_v56, %v2771_v59 }
 0x4c5   :  { %v2773_v34 = vpop.xlane.xlu1 %2772  ;;  %2924 = vadd.xlane.f32.xlu1 %v5616_v5 }
 0x4c6   :  { %4034 = vpow2.f32 %v2872_v2  ;;  %v2866_v11 = vmul.f32 1.442695, %v2814_v29  ;;  %v2815_v41 = vsub.f32 %v5502_v0, %v2773_v34 }
 0x4c8   :  { %4036 = vpow2.f32 %v2866_v11  ;;  %v2868_v8 = vmul.f32 1.442695, %v2815_v41 }
 0x4ca   :  { %4038 = vpow2.f32 %v2868_v8 }
 0x4ce   :  { %v5621_v60 = vpop.eup %4032 }
 0x4cf   :  { %2934 = vadd.xlane.f32.xlu0 %v5621_v60  ;;  %v2783_v44 = vpop.xlane.xlu0 %2782 }
 0x4d0   :  { %v5624_v47 = vpop.eup %4034  ;;  %v2820_v58 = vsub.f32 %v5509_v17, %v2783_v44 }
 0x4d1   :  { %v2785_v56 = vpop.xlane.xlu1 %2784  ;;  %2936 = vadd.xlane.f32.xlu1 %v5624_v47 }
 0x4d2   :  { %v5628_v6 = vpop.eup %4036  ;;  %v2878_v20 = vmul.f32 1.442695, %v2820_v58  ;;  %v2821_v0 = vsub.f32 %v5512_v30, %v2785_v56 }
 0x4d3   :  { %2930 = vadd.xlane.f32.xlu0 %v5628_v6  ;;  %v2779_v39 = vpop.xlane.xlu0 %2778 }
 0x4d4   :  { %v5632_v32 = vpop.eup %4038  ;;  %4040 = vpow2.f32 %v2878_v20  ;;  %v2880_v53 = vmul.f32 1.442695, %v2821_v0  ;;  %v2818_v27 = vsub.f32 %v5515_v12, %v2779_v39 }
 0x4d5   :  { %v2781_v49 = vpop.xlane.xlu1 %2780  ;;  %2932 = vadd.xlane.f32.xlu1 %v5632_v32 }
 0x4d6   :  { %4042 = vpow2.f32 %v2880_v53  ;;  %v2874_v17 = vmul.f32 1.442695, %v2818_v27  ;;  %v2819_v51 = vsub.f32 %v5518_v63, %v2781_v49 }
 0x4d8   :  { %4044 = vpow2.f32 %v2874_v17  ;;  %v2876_v37 = vmul.f32 1.442695, %v2819_v51 }
 0x4da   :  { %4046 = vpow2.f32 %v2876_v37 }
 0x4de   :  { %v5637_v30 = vpop.eup %4040 }
 0x4df   :  { %2942 = vadd.xlane.f32.xlu0 %v5637_v30 }
 0x4e0   :  { %v5640_v24 = vpop.eup %4042  ;;  %v2787_v35 = vpop.xlane.xlu0 %2786 }
 0x4e1   :  { %v2822_v21 = vsub.f32 %v5525_v31, %v2787_v35  ;;  %2944 = vadd.xlane.f32.xlu1 %v5640_v24 }
 0x4e2   :  { %v5644_v12 = vpop.eup %4044  ;;  %v2789_v16 = vpop.xlane.xlu1 %2788 }
 0x4e3   :  { %v2882_v7 = vmul.f32 1.442695, %v2822_v21  ;;  %v2823_v63 = vsub.f32 %v5528_v42, %v2789_v16  ;;  %2938 = vadd.xlane.f32.xlu0 %v5644_v12 }
 0x4e4   :  { %v5648_v33 = vpop.eup %4046  ;;  %v2791_v14 = vpop.xlane.xlu0 %2790 }
 0x4e5   :  { %4048 = vpow2.f32 %v2882_v7  ;;  %v2884_v3 = vmul.f32 1.442695, %v2823_v63  ;;  %v2824_v52 = vsub.f32 %v5531_v61, %v2791_v14  ;;  %2940 = vadd.xlane.f32.xlu1 %v5648_v33 }
 0x4e6   :  { %v2793_v31 = vpop.xlane.xlu1 %2792 }
 0x4e7   :  { %4050 = vpow2.f32 %v2884_v3  ;;  %v2886_v40 = vmul.f32 1.442695, %v2824_v52  ;;  %v2825_v23 = vsub.f32 %v5534_v54, %v2793_v31 }
 0x4e9   :  { %4052 = vpow2.f32 %v2886_v40  ;;  %v2888_v50 = vmul.f32 1.442695, %v2825_v23 }
 0x4eb   :  { %4054 = vpow2.f32 %v2888_v50 }
 0x4ef   :  { %v5653_v42 = vpop.eup %4048 }
 0x4f0   :  { %2946 = vadd.xlane.f32.xlu0 %v5653_v42 }
 0x4f1   :  { %v5656_v22 = vpop.eup %4050 }
 0x4f2   :  { %2948 = vadd.xlane.f32.xlu1 %v5656_v22 }
 0x4f3   :  { %v5659_v46 = vpop.eup %4052 }
 0x4f4   :  { %2950 = vadd.xlane.f32.xlu0 %v5659_v46 }
 0x4f5   :  { %v5662_v61 = vpop.eup %4054 }
 0x4f6   :  { %2952 = vadd.xlane.f32.xlu1 %v5662_v61 }
 0x50c   :  { %v2895_v54 = vpop.xlane.xlu0 %2894 }
 0x50d   :  { %4056 = vrcp.f32 %v2895_v54 }
 0x510   :  { %v2897_v59 = vpop.xlane.xlu1 %2896  ;;  %v2891_v2 = vpop.xlane.xlu0 %2890 }
 0x511   :  { %4058 = vrcp.f32 %v2897_v59 }
 0x512   :  { %4060 = vrcp.f32 %v2891_v2 }
 0x514   :  { %v2893_v29 = vpop.xlane.xlu1 %2892 }
 0x515   :  { %4062 = vrcp.f32 %v2893_v29 }
 0x517   :  { %v4057_v34 = vpop.eup %4056 }
 0x518   :  { %v2959_v11 = vmul.f32 %v4057_v34, %v5541_v43 }
 0x51a   :  { %3020 = vst [vmem:[%s5800_s7 + $0x10] sm:$0xff] %v2959_v11 }
 0x51b   :  { %v4059_v41 = vpop.eup %4058 }
 0x51c   :  { %v4061_v8 = vpop.eup %4060  ;;  %v2961_v44 = vmul.f32 %v4059_v41, %v5547_v9  ;;  %v2903_v58 = vpop.xlane.xlu0 %2902 }
 0x51d   :  { %v2955_v56 = vmul.f32 %v4061_v8, %v5545_v4  ;;  %4064 = vrcp.f32 %v2903_v58 }
 0x51e   :  { %3021 = vst [vmem:[%s5800_s7 + $0x18] sm:$0xff] %v2961_v44  ;;  %v2905_v20 = vpop.xlane.xlu1 %2904 }
 0x51f   :  { %v4063_v0 = vpop.eup %4062  ;;  %3018 = vst [vmem:[%s5800_s7] sm:$0xff] %v2955_v56  ;;  %4066 = vrcp.f32 %v2905_v20 }
 0x520   :  { %v2957_v43 = vmul.f32 %v4063_v0, %v5553_v15  ;;  %v2899_v39 = vpop.xlane.xlu0 %2898 }
 0x521   :  { %4068 = vrcp.f32 %v2899_v39 }
 0x522   :  { %3019 = vst [vmem:[%s5800_s7 + $0x8] sm:$0xff] %v2957_v43  ;;  %v2901_v4 = vpop.xlane.xlu1 %2900 }
 0x523   :  { %4070 = vrcp.f32 %v2901_v4 }
 0x527   :  { %v4065_v9 = vpop.eup %4064 }
 0x528   :  { %v2967_v53 = vmul.f32 %v4065_v9, %v5557_v55 }
 0x529   :  { %v4067_v27 = vpop.eup %4066 }
 0x52a   :  { %3024 = vst [vmem:[%s5800_s7 + $0x30] sm:$0xff] %v2967_v53  ;;  %v2969_v49 = vmul.f32 %v4067_v27, %v5560_v18 }
 0x52b   :  { %v4069_v17 = vpop.eup %4068 }
 0x52c   :  { %3025 = vst [vmem:[%s5800_s7 + $0x38] sm:$0xff] %v2969_v49  ;;  %v2963_v15 = vmul.f32 %v4069_v17, %v5564_v62  ;;  %v2911_v51 = vpop.xlane.xlu0 %2910 }
 0x52d   :  { %v4071_v37 = vpop.eup %4070  ;;  %4072 = vrcp.f32 %v2911_v51 }
 0x52e   :  { %3022 = vst [vmem:[%s5800_s7 + $0x20] sm:$0xff] %v2963_v15  ;;  %v2965_v55 = vmul.f32 %v4071_v37, %v5568_v28  ;;  %v2913_v35 = vpop.xlane.xlu1 %2912 }
 0x52f   :  { %4074 = vrcp.f32 %v2913_v35 }
 0x530   :  { %3023 = vst [vmem:[%s5800_s7 + $0x28] sm:$0xff] %v2965_v55  ;;  %v2907_v18 = vpop.xlane.xlu0 %2906 }
 0x531   :  { %4076 = vrcp.f32 %v2907_v18 }
 0x532   :  { %v2909_v21 = vpop.xlane.xlu1 %2908 }
 0x533   :  { %4078 = vrcp.f32 %v2909_v21 }
 0x537   :  { %v4073_v62 = vpop.eup %4072 }
 0x538   :  { %v2975_v16 = vmul.f32 %v4073_v62, %v5573_v10 }
 0x539   :  { %v4075_v7 = vpop.eup %4074 }
 0x53a   :  { %3028 = vst [vmem:[%s5800_s7 + $0x50] sm:$0xff] %v2975_v16  ;;  %v2977_v28 = vmul.f32 %v4075_v7, %v5576_v45 }
 0x53b   :  { %v4077_v63 = vpop.eup %4076 }
 0x53c   :  { %3029 = vst [vmem:[%s5800_s7 + $0x58] sm:$0xff] %v2977_v28  ;;  %v2971_v14 = vmul.f32 %v4077_v63, %v5580_v48  ;;  %v2919_v3 = vpop.xlane.xlu0 %2918 }
 0x53d   :  { %v4079_v52 = vpop.eup %4078  ;;  %4080 = vrcp.f32 %v2919_v3 }
 0x53e   :  { %3026 = vst [vmem:[%s5800_s7 + $0x40] sm:$0xff] %v2971_v14  ;;  %v2973_v10 = vmul.f32 %v4079_v52, %v5584_v1  ;;  %v2921_v31 = vpop.xlane.xlu1 %2920 }
 0x53f   :  { %4082 = vrcp.f32 %v2921_v31 }
 0x540   :  { %3027 = vst [vmem:[%s5800_s7 + $0x48] sm:$0xff] %v2973_v10  ;;  %v2915_v45 = vpop.xlane.xlu0 %2914 }
 0x541   :  { %4084 = vrcp.f32 %v2915_v45 }
 0x542   :  { %v2917_v40 = vpop.xlane.xlu1 %2916 }
 0x543   :  { %4086 = vrcp.f32 %v2917_v40 }
 0x547   :  { %v4081_v48 = vpop.eup %4080 }
 0x548   :  { %v2983_v23 = vmul.f32 %v4081_v48, %v5589_v25 }
 0x549   :  { %v4083_v50 = vpop.eup %4082 }
 0x54a   :  { %3032 = vst [vmem:[%s5800_s7 + $0x70] sm:$0xff] %v2983_v23  ;;  %v2985_v1 = vmul.f32 %v4083_v50, %v5592_v13 }
 0x54b   :  { %v4085_v54 = vpop.eup %4084 }
 0x54c   :  { %3033 = vst [vmem:[%s5800_s7 + $0x78] sm:$0xff] %v2985_v1  ;;  %v2979_v59 = vmul.f32 %v4085_v54, %v5596_v38  ;;  %v2927_v2 = vpop.xlane.xlu0 %2926 }
 0x54d   :  { %v4087_v29 = vpop.eup %4086  ;;  %4088 = vrcp.f32 %v2927_v2 }
 0x54e   :  { %3030 = vst [vmem:[%s5800_s7 + $0x60] sm:$0xff] %v2979_v59  ;;  %v2981_v25 = vmul.f32 %v4087_v29, %v5600_v36  ;;  %v2929_v34 = vpop.xlane.xlu1 %2928 }
 0x54f   :  { %4090 = vrcp.f32 %v2929_v34 }
 0x550   :  { %3031 = vst [vmem:[%s5800_s7 + $0x68] sm:$0xff] %v2981_v25  ;;  %v2923_v13 = vpop.xlane.xlu0 %2922 }
 0x551   :  { %4092 = vrcp.f32 %v2923_v13 }
 0x552   :  { %v2925_v11 = vpop.xlane.xlu1 %2924 }
 0x553   :  { %4094 = vrcp.f32 %v2925_v11 }
 0x557   :  { %v4089_v38 = vpop.eup %4088 }
 0x558   :  { %v2991_v41 = vmul.f32 %v4089_v38, %v5605_v57 }
 0x559   :  { %v4091_v8 = vpop.eup %4090 }
 0x55a   :  { %3036 = vst [vmem:[%s5800_s7 + $0x90] sm:$0xff] %v2991_v41  ;;  %v2993_v36 = vmul.f32 %v4091_v8, %v5608_v19 }
 0x55b   :  { %v4093_v44 = vpop.eup %4092 }
 0x55c   :  { %3037 = vst [vmem:[%s5800_s7 + $0x98] sm:$0xff] %v2993_v36  ;;  %v2987_v58 = vmul.f32 %v4093_v44, %v5612_v26  ;;  %v2935_v56 = vpop.xlane.xlu0 %2934 }
 0x55d   :  { %v4095_v20 = vpop.eup %4094  ;;  %4096 = vrcp.f32 %v2935_v56 }
 0x55e   :  { %3034 = vst [vmem:[%s5800_s7 + $0x80] sm:$0xff] %v2987_v58  ;;  %v2989_v57 = vmul.f32 %v4095_v20, %v5616_v5  ;;  %v2937_v0 = vpop.xlane.xlu1 %2936 }
 0x55f   :  { %4098 = vrcp.f32 %v2937_v0 }
 0x560   :  { %3035 = vst [vmem:[%s5800_s7 + $0x88] sm:$0xff] %v2989_v57  ;;  %v2931_v19 = vpop.xlane.xlu0 %2930 }
 0x561   :  { %4100 = vrcp.f32 %v2931_v19 }
 0x562   :  { %v2933_v43 = vpop.xlane.xlu1 %2932 }
 0x563   :  { %4102 = vrcp.f32 %v2933_v43 }
 0x567   :  { %v4097_v26 = vpop.eup %4096 }
 0x568   :  { %v2999_v39 = vmul.f32 %v4097_v26, %v5621_v60 }
 0x569   :  { %v4099_v4 = vpop.eup %4098 }
 0x56a   :  { %3040 = vst [vmem:[%s5800_s7 + $0xb0] sm:$0xff] %v2999_v39  ;;  %v3001_v5 = vmul.f32 %v4099_v4, %v5624_v47 }
 0x56b   :  { %v4101_v9 = vpop.eup %4100 }
 0x56c   :  { %3041 = vst [vmem:[%s5800_s7 + $0xb8] sm:$0xff] %v3001_v5  ;;  %v2995_v53 = vmul.f32 %v4101_v9, %v5628_v6  ;;  %v2943_v27 = vpop.xlane.xlu0 %2942 }
 0x56d   :  { %v4103_v49 = vpop.eup %4102  ;;  %4104 = vrcp.f32 %v2943_v27 }
 0x56e   :  { %3038 = vst [vmem:[%s5800_s7 + $0xa0] sm:$0xff] %v2995_v53  ;;  %v2997_v60 = vmul.f32 %v4103_v49, %v5632_v32  ;;  %v2945_v17 = vpop.xlane.xlu1 %2944 }
 0x56f   :  { %4106 = vrcp.f32 %v2945_v17 }
 0x570   :  { %3039 = vst [vmem:[%s5800_s7 + $0xa8] sm:$0xff] %v2997_v60  ;;  %v2939_v47 = vpop.xlane.xlu0 %2938 }
 0x571   :  { %4108 = vrcp.f32 %v2939_v47 }
 0x572   :  { %v2941_v15 = vpop.xlane.xlu1 %2940 }
 0x573   :  { %4110 = vrcp.f32 %v2941_v15 }
 0x577   :  { %v4105_v6 = vpop.eup %4104 }
 0x578   :  { %v3007_v51 = vmul.f32 %v4105_v6, %v5637_v30 }
 0x579   :  { %v4107_v37 = vpop.eup %4106 }
 0x57a   :  { %3044 = vst [vmem:[%s5800_s7 + $0xd0] sm:$0xff] %v3007_v51  ;;  %v3009_v32 = vmul.f32 %v4107_v37, %v5640_v24 }
 0x57b   :  { %v4109_v55 = vpop.eup %4108 }
 0x57c   :  { %3045 = vst [vmem:[%s5800_s7 + $0xd8] sm:$0xff] %v3009_v32  ;;  %v3003_v35 = vmul.f32 %v4109_v55, %v5644_v12 }
 0x57d   :  { %v4111_v18 = vpop.eup %4110  ;;  %v2947_v21 = vpop.xlane.xlu0 %2946 }
 0x57e   :  { %3042 = vst [vmem:[%s5800_s7 + $0xc0] sm:$0xff] %v3003_v35  ;;  %v3005_v30 = vmul.f32 %v4111_v18, %v5648_v33  ;;  %4112 = vrcp.f32 %v2947_v21 }
 0x57f   :  { %v2949_v62 = vpop.xlane.xlu1 %2948 }
 0x580   :  { %3043 = vst [vmem:[%s5800_s7 + $0xc8] sm:$0xff] %v3005_v30  ;;  %4114 = vrcp.f32 %v2949_v62 }
 0x581   :  { %v2951_v24 = vpop.xlane.xlu0 %2950 }
 0x582   :  { %4116 = vrcp.f32 %v2951_v24 }
 0x583   :  { %v2953_v16 = vpop.xlane.xlu1 %2952 }
 0x584   :  { %4118 = vrcp.f32 %v2953_v16 }
 0x588   :  { %v4113_v12 = vpop.eup %4112 }
 0x589   :  { %v3011_v7 = vmul.f32 %v4113_v12, %v5653_v42 }
 0x58a   :  { %v4115_v28 = vpop.eup %4114 }
 0x58b   :  { %3046 = vst [vmem:[%s5800_s7 + $0xe0] sm:$0xff] %v3011_v7  ;;  %v3013_v33 = vmul.f32 %v4115_v28, %v5656_v22 }
 0x58c   :  { %v4117_v63 = vpop.eup %4116 }
 0x58d   :  { %3047 = vst [vmem:[%s5800_s7 + $0xe8] sm:$0xff] %v3013_v33  ;;  %v3015_v14 = vmul.f32 %v4117_v63, %v5659_v46 }
 0x58e   :  { %v4119_v3 = vpop.eup %4118 }
 0x58f   :  { %3048 = vst [vmem:[%s5800_s7 + $0xf0] sm:$0xff] %v3015_v14  ;;  %v3017_v42 = vmul.f32 %v4119_v3, %v5662_v61 }
 0x591   :  { %3049 = vst [vmem:[%s5800_s7 + $0xf8] sm:$0xff] %v3017_v42 }

</bundles_post_ra>
